<compile_context>
chip_gen: v5e
topology: v5e:2x2
jax: 0.10.0
libtpu: 0.0.40
codegen_flags: <defaults>
</compile_context>

<pallas_src>
import functools

import jax
import jax.numpy as jnp
from jax.experimental import pallas as pl
from jax.experimental.pallas import tpu as pltpu


def _global_conv_kernel(x_ref, hmask_ref, wmask_ref, w1_ref, w2_ref, out_ref,
                        *, k, width):
    """One grid step = `nb` batch planes packed along the lane axis.

    x_ref    : (1, C, Ltot)     f32   Ltot = nb * H * W (planes concat on lanes)
    hmask_ref: (k, 1, Ltot)     f32   0/1 validity mask per H-direction tap
    wmask_ref: (k, 1, Ltot)     f32   0/1 validity mask per W-direction tap
    w1_ref   : (2m, 2*k*C + 1)  bf16  block-diag [wl1|0|bl1 ; 0|wr1|br1]
    w2_ref   : (m,  2*k*m + 1)  bf16  [wl2 | wr2 | bl2+br2]
    out_ref  : (1, m, Ltot)     f32
    """
    p = (k - 1) // 2
    Ltot = x_ref.shape[-1]
    m = out_ref.shape[1]

    x = x_ref[0]                           # (C, Ltot)
    hm = hmask_ref[...]
    wm = wmask_ref[...]
    w1 = w1_ref[...]
    w2 = w2_ref[...]
    ones_row = jnp.ones((1, Ltot), jnp.float32)   # bias row of the contraction

    # Shifted spatial taps via XLU rolls on the flattened plane; the 0/1 masks
    # implement the conv zero padding and zero exactly the positions where a
    # roll would cross a plane (or wrap) boundary.
    def taps_h(v):
        out = []
        for dk in range(k):
            s = dk - p
            if s == 0:
                out.append(v)
            else:
                out.append(pltpu.roll(v, (-s * width) % Ltot, axis=1) * hm[dk])
        return out

    def taps_w(v):
        out = []
        for dk in range(k):
            s = dk - p
            if s == 0:
                out.append(v)
            else:
                out.append(pltpu.roll(v, (-s) % Ltot, axis=1) * wm[dk])
        return out

    # Stage 1: conv_l_1 (k,1 over H) and conv_r_1 (1,k over W) fused into one
    # block-diagonal matmul, biases folded into the contraction.
    rhs1 = jnp.concatenate(taps_h(x) + taps_w(x) + [ones_row],
                           axis=0).astype(jnp.bfloat16)          # (2kC+1, Ltot)
    y1 = jnp.dot(w1, rhs1, preferred_element_type=jnp.float32)   # (2m, Ltot)
    x_l = y1[:m]                                                 # left, +bl1
    t_r = jnp.maximum(y1[m:], 0.0)                               # relu_r_1

    # Stage 2: conv_l_2 (1,k over W) on x_l plus conv_r_2 (k,1 over H) on
    # relu(x_r); taps, both branches, both biases AND the final x_l + x_r add
    # fused into a single matmul.
    rhs2 = jnp.concatenate(taps_w(x_l) + taps_h(t_r) + [ones_row],
                           axis=0).astype(jnp.bfloat16)          # (2km+1, Ltot)
    out = jnp.dot(w2, rhs2, preferred_element_type=jnp.float32)  # (m, Ltot)

    out_ref[0] = out.astype(out_ref.dtype)                       # lane-dense store


def _choose_batch_block(n, cap=32):
    """Batch planes packed per grid step.

    Big enough to amortize the ~0.35us per-grid-step overhead and widen the
    matmul lane (N) dimension, while keeping >= 2 grid steps whenever n >= 2
    so the "parallel" batch axis can feed both TensorCores on v7x.  Per-step
    VMEM stays tiny (~12*nb KiB), far under every generation's limit.
    """
    return max(1, min(cap, (n + 1) // 2))


def _flat_w(w):
    # (out, in, k) -> (out, k*in): column dk*in + c holds w[:, c, dk], which
    # matches the [tap0 channels..., tap1 channels, ...] RHS row order.
    w = w.astype(jnp.float32)
    return jnp.transpose(w, (0, 2, 1)).reshape(w.shape[0], -1)


def global_conv(x, params, *, k=7):
    """x: (N, C, H, W) float32. Returns (N, m_ch, H, W) float32."""
    N, C, H, W = x.shape
    p = (k - 1) // 2
    m = params["bl1"].shape[0]
    L = H * W

    nb = _choose_batch_block(N)
    n_pad = (-N) % nb
    if n_pad:                       # pad batch instead of collapsing to nb=1
        x = jnp.concatenate(
            [x, jnp.zeros((n_pad,) + x.shape[1:], x.dtype)], axis=0)
    Np = N + n_pad
    G = Np // nb
    Ltot = nb * L                   # lane-dense if L is a multiple of 128

    # Pack nb batch planes along the lane-dense minor dim: (G, C, nb*L).
    x_pack = (x.astype(jnp.float32)
              .reshape(G, nb, C, L)
              .transpose(0, 2, 1, 3)
              .reshape(G, C, Ltot))

    # 0/1 boundary masks implementing the conv zero padding on the flattened
    # plane (one row per tap, tiled across the nb packed planes).
    idx = jnp.arange(L, dtype=jnp.int32)
    hmask = jnp.stack(
        [((idx + (dk - p) * W >= 0) & (idx + (dk - p) * W < L))
         for dk in range(k)]).astype(jnp.float32).reshape(k, 1, L)
    wmask = jnp.stack(
        [((idx % W + (dk - p) >= 0) & (idx % W + (dk - p) < W))
         for dk in range(k)]).astype(jnp.float32).reshape(k, 1, L)
    hmask = jnp.tile(hmask, (1, 1, nb))
    wmask = jnp.tile(wmask, (1, 1, nb))

    # Stage-1 fused weights: block-diag [left H-taps | right W-taps] with the
    # biases folded in as an extra contraction column.  (2m, 2kC+1) bf16.
    wl1f, wr1f = _flat_w(params["wl1"]), _flat_w(params["wr1"])
    z1 = jnp.zeros_like(wl1f)
    bl1 = params["bl1"].astype(jnp.float32)[:, None]
    br1 = params["br1"].astype(jnp.float32)[:, None]
    w1_mat = jnp.concatenate([
        jnp.concatenate([wl1f, z1, bl1], axis=1),
        jnp.concatenate([z1, wr1f, br1], axis=1),
    ], axis=0).astype(jnp.bfloat16)

    # Stage-2 fused weights: [left W-taps | right H-taps | summed bias];
    # the final x_l + x_r add happens inside this matmul.  (m, 2km+1) bf16.
    wl2f, wr2f = _flat_w(params["wl2"]), _flat_w(params["wr2"])
    b2 = (params["bl2"] + params["br2"]).astype(jnp.float32)[:, None]
    w2_mat = jnp.concatenate([wl2f, wr2f, b2], axis=1).astype(jnp.bfloat16)

    kern = functools.partial(_global_conv_kernel, k=k, width=W)
    const3 = lambda b: (0, 0, 0)
    const2 = lambda b: (0, 0)

    out_pack = pl.pallas_call(
        kern,
        out_shape=jax.ShapeDtypeStruct((G, m, Ltot), jnp.float32),
        grid_spec=pltpu.PrefetchScalarGridSpec(
            num_scalar_prefetch=0,
            grid=(G,),
            in_specs=[
                pl.BlockSpec((1, C, Ltot), lambda b: (b, 0, 0)),
                pl.BlockSpec((k, 1, Ltot), const3),
                pl.BlockSpec((k, 1, Ltot), const3),
                pl.BlockSpec(tuple(w1_mat.shape), const2),
                pl.BlockSpec(tuple(w2_mat.shape), const2),
            ],
            out_specs=pl.BlockSpec((1, m, Ltot), lambda b: (b, 0, 0)),
        ),
        compiler_params=pltpu.CompilerParams(
            dimension_semantics=("parallel",)),
    )(x_pack, hmask, wmask, w1_mat, w2_mat)

    out = (out_pack.reshape(G, m, nb, L)
           .transpose(0, 2, 1, 3)
           .reshape(Np, m, H, W))
    return out[:N]


def init_params(key, in_ch, m_ch, k=7):
    """Deterministic PyTorch-like uniform init for the 4 separable convs."""
    ks = jax.random.split(key, 8)

    def u(kk, shape, fan_in):
        bound = 1.0 / jnp.sqrt(jnp.float32(fan_in))
        return jax.random.uniform(kk, shape, jnp.float32, -bound, bound)

    return {
        # conv_l_1: Conv2d(in_ch, m_ch, (k,1)) -> weight squeezed to (m, in, k)
        "wl1": u(ks[0], (m_ch, in_ch, k), in_ch * k),
        "bl1": u(ks[1], (m_ch,), in_ch * k),
        # conv_l_2: Conv2d(m_ch, m_ch, (1,k))
        "wl2": u(ks[2], (m_ch, m_ch, k), m_ch * k),
        "bl2": u(ks[3], (m_ch,), m_ch * k),
        # conv_r_1: Conv2d(in_ch, m_ch, (1,k))
        "wr1": u(ks[4], (m_ch, in_ch, k), in_ch * k),
        "br1": u(ks[5], (m_ch,), in_ch * k),
        # conv_r_2: Conv2d(m_ch, m_ch, (k,1))
        "wr2": u(ks[6], (m_ch, m_ch, k), m_ch * k),
        "br2": u(ks[7], (m_ch,), m_ch * k),
    }


def _reference_global_conv(x, params, *, k=7):
    """Pure-JAX reference (XLA convs, f32 HIGHEST) for correctness checking."""
    p = (k - 1) // 2

    def conv(inp, w4, b, pad):
        out = jax.lax.conv_general_dilated(
            inp, w4, window_strides=(1, 1),
            padding=((pad[0], pad[0]), (pad[1], pad[1])),
            dimension_numbers=("NCHW", "OIHW", "NCHW"),
            precision=jax.lax.Precision.HIGHEST)
        return out + b[None, :, None, None]

    wl1 = params["wl1"][:, :, :, None]   # (m, C, k, 1)
    wl2 = params["wl2"][:, :, None, :]   # (m, m, 1, k)
    wr1 = params["wr1"][:, :, None, :]
    wr2 = params["wr2"][:, :, :, None]

    x_l = conv(conv(x, wl1, params["bl1"], (p, 0)), wl2, params["bl2"], (0, p))
    x_r = conv(x, wr1, params["br1"], (0, p))
    x_r = jnp.maximum(x_r, 0.0)
    x_r = conv(x_r, wr2, params["br2"], (p, 0))
    return x_l + x_r


if __name__ == "__main__":
    in_ch, m_ch, H, W, k = 4, 8, 16, 16, 7
    key = jax.random.PRNGKey(0)

    # N=4 exercises the lane-packing path (nb=2, grid=2); N=5 additionally
    # exercises the pad-to-multiple-of-nb path (nb=3, padded to 6).
    for N in (4, 5):
        kx, kp = jax.random.split(jax.random.fold_in(key, N))
        x = jax.random.normal(kx, (N, in_ch, H, W), jnp.float32)
        params = init_params(kp, in_ch, m_ch, k)

        out = jax.block_until_ready(global_conv(x, params, k=k))
        ref = jax.block_until_ready(_reference_global_conv(x, params, k=k))

        assert out.shape == (N, m_ch, H, W), out.shape
        max_err = float(jnp.max(jnp.abs(out - ref)))
        # bf16 MXU operands with f32 accumulation vs an f32-HIGHEST XLA
        # reference -> bf16-class accuracy (typically ~1e-3, bounded ~5e-3).
        assert jnp.allclose(out, ref, atol=1e-2, rtol=1e-2), max_err

    print("KERNEL_OK")
</pallas_src>

<mosaic_0001>
module attributes {stable_mosaic.version = 11 : i64} {
  func.func @_global_conv_kernel(%arg0: i32, %arg1: memref<1x4x512xf32, #tpu.memory_space<vmem>>, %arg2: memref<7x1x512xf32, #tpu.memory_space<vmem>>, %arg3: memref<7x1x512xf32, #tpu.memory_space<vmem>>, %arg4: memref<16x57xbf16, #tpu.memory_space<vmem>>, %arg5: memref<8x113xbf16, #tpu.memory_space<vmem>>, %arg6: memref<1x8x512xf32, #tpu.memory_space<vmem>>) attributes {dimension_semantics = [#tpu.dimension_semantics<parallel>], iteration_bounds = array<i64: 2>, scalar_prefetch = 0 : i64, scratch_operands = 0 : i64, tpu.core_type = #tpu.core_type<tc>, window_params = [{transform_indices = @transform_0, window_bounds = array<i64: 1, 4, 512>}, {pipeline_mode = #tpu.pipeline_mode<synchronous>, transform_indices = @transform_1, window_bounds = array<i64: 7, 1, 512>}, {pipeline_mode = #tpu.pipeline_mode<synchronous>, transform_indices = @transform_2, window_bounds = array<i64: 7, 1, 512>}, {pipeline_mode = #tpu.pipeline_mode<synchronous>, transform_indices = @transform_3, window_bounds = array<i64: 16, 57>}, {pipeline_mode = #tpu.pipeline_mode<synchronous>, transform_indices = @transform_4, window_bounds = array<i64: 8, 113>}, {transform_indices = @transform_5, window_bounds = array<i64: 1, 8, 512>}]} {
    %c0 = arith.constant 0 : index
    %c0_0 = arith.constant 0 : index
    %c0_1 = arith.constant 0 : index
    %0 = vector.load %arg1[%c0, %c0_0, %c0_1] : memref<1x4x512xf32, #tpu.memory_space<vmem>>, vector<1x4x512xf32>
    %1 = vector.shape_cast %0 : vector<1x4x512xf32> to vector<4x512xf32>
    %c0_2 = arith.constant 0 : index
    %c0_3 = arith.constant 0 : index
    %c0_4 = arith.constant 0 : index
    %2 = vector.load %arg2[%c0_2, %c0_3, %c0_4] : memref<7x1x512xf32, #tpu.memory_space<vmem>>, vector<7x1x512xf32>
    %c0_5 = arith.constant 0 : index
    %c0_6 = arith.constant 0 : index
    %c0_7 = arith.constant 0 : index
    %3 = vector.load %arg3[%c0_5, %c0_6, %c0_7] : memref<7x1x512xf32, #tpu.memory_space<vmem>>, vector<7x1x512xf32>
    %c0_8 = arith.constant 0 : index
    %c0_9 = arith.constant 0 : index
    %4 = vector.load %arg4[%c0_8, %c0_9] : memref<16x57xbf16, #tpu.memory_space<vmem>>, vector<16x57xbf16>
    %c0_10 = arith.constant 0 : index
    %c0_11 = arith.constant 0 : index
    %5 = vector.load %arg5[%c0_10, %c0_11] : memref<8x113xbf16, #tpu.memory_space<vmem>>, vector<8x113xbf16>
    %cst = arith.constant 1.000000e+00 : f32
    %6 = vector.broadcast %cst : f32 to vector<1x512xf32>
    %c48_i32 = arith.constant 48 : i32
    %7 = tpu.dynamic_rotate %1 by %c48_i32 dim 1 : vector<4x512xf32>, i32 -> vector<4x512xf32>
    %8 = vector.extract_strided_slice %2 {offsets = [0, 0, 0], sizes = [1, 1, 512], strides = [1, 1, 1]} : vector<7x1x512xf32> to vector<1x1x512xf32>
    %9 = vector.shape_cast %8 : vector<1x1x512xf32> to vector<1x512xf32>
    %10 = vector.broadcast %9 : vector<1x512xf32> to vector<4x512xf32>
    %11 = arith.mulf %7, %10 : vector<4x512xf32>
    %c32_i32 = arith.constant 32 : i32
    %12 = tpu.dynamic_rotate %1 by %c32_i32 dim 1 : vector<4x512xf32>, i32 -> vector<4x512xf32>
    %13 = vector.extract_strided_slice %2 {offsets = [1, 0, 0], sizes = [1, 1, 512], strides = [1, 1, 1]} : vector<7x1x512xf32> to vector<1x1x512xf32>
    %14 = vector.shape_cast %13 : vector<1x1x512xf32> to vector<1x512xf32>
    %15 = vector.broadcast %14 : vector<1x512xf32> to vector<4x512xf32>
    %16 = arith.mulf %12, %15 : vector<4x512xf32>
    %c16_i32 = arith.constant 16 : i32
    %17 = tpu.dynamic_rotate %1 by %c16_i32 dim 1 : vector<4x512xf32>, i32 -> vector<4x512xf32>
    %18 = vector.extract_strided_slice %2 {offsets = [2, 0, 0], sizes = [1, 1, 512], strides = [1, 1, 1]} : vector<7x1x512xf32> to vector<1x1x512xf32>
    %19 = vector.shape_cast %18 : vector<1x1x512xf32> to vector<1x512xf32>
    %20 = vector.broadcast %19 : vector<1x512xf32> to vector<4x512xf32>
    %21 = arith.mulf %17, %20 : vector<4x512xf32>
    %c496_i32 = arith.constant 496 : i32
    %22 = tpu.dynamic_rotate %1 by %c496_i32 dim 1 : vector<4x512xf32>, i32 -> vector<4x512xf32>
    %23 = vector.extract_strided_slice %2 {offsets = [4, 0, 0], sizes = [1, 1, 512], strides = [1, 1, 1]} : vector<7x1x512xf32> to vector<1x1x512xf32>
    %24 = vector.shape_cast %23 : vector<1x1x512xf32> to vector<1x512xf32>
    %25 = vector.broadcast %24 : vector<1x512xf32> to vector<4x512xf32>
    %26 = arith.mulf %22, %25 : vector<4x512xf32>
    %c480_i32 = arith.constant 480 : i32
    %27 = tpu.dynamic_rotate %1 by %c480_i32 dim 1 : vector<4x512xf32>, i32 -> vector<4x512xf32>
    %28 = vector.extract_strided_slice %2 {offsets = [5, 0, 0], sizes = [1, 1, 512], strides = [1, 1, 1]} : vector<7x1x512xf32> to vector<1x1x512xf32>
    %29 = vector.shape_cast %28 : vector<1x1x512xf32> to vector<1x512xf32>
    %30 = vector.broadcast %29 : vector<1x512xf32> to vector<4x512xf32>
    %31 = arith.mulf %27, %30 : vector<4x512xf32>
    %c464_i32 = arith.constant 464 : i32
    %32 = tpu.dynamic_rotate %1 by %c464_i32 dim 1 : vector<4x512xf32>, i32 -> vector<4x512xf32>
    %33 = vector.extract_strided_slice %2 {offsets = [6, 0, 0], sizes = [1, 1, 512], strides = [1, 1, 1]} : vector<7x1x512xf32> to vector<1x1x512xf32>
    %34 = vector.shape_cast %33 : vector<1x1x512xf32> to vector<1x512xf32>
    %35 = vector.broadcast %34 : vector<1x512xf32> to vector<4x512xf32>
    %36 = arith.mulf %32, %35 : vector<4x512xf32>
    %c3_i32 = arith.constant 3 : i32
    %37 = tpu.dynamic_rotate %1 by %c3_i32 dim 1 : vector<4x512xf32>, i32 -> vector<4x512xf32>
    %38 = vector.extract_strided_slice %3 {offsets = [0, 0, 0], sizes = [1, 1, 512], strides = [1, 1, 1]} : vector<7x1x512xf32> to vector<1x1x512xf32>
    %39 = vector.shape_cast %38 : vector<1x1x512xf32> to vector<1x512xf32>
    %40 = vector.broadcast %39 : vector<1x512xf32> to vector<4x512xf32>
    %41 = arith.mulf %37, %40 : vector<4x512xf32>
    %c2_i32 = arith.constant 2 : i32
    %42 = tpu.dynamic_rotate %1 by %c2_i32 dim 1 : vector<4x512xf32>, i32 -> vector<4x512xf32>
    %43 = vector.extract_strided_slice %3 {offsets = [1, 0, 0], sizes = [1, 1, 512], strides = [1, 1, 1]} : vector<7x1x512xf32> to vector<1x1x512xf32>
    %44 = vector.shape_cast %43 : vector<1x1x512xf32> to vector<1x512xf32>
    %45 = vector.broadcast %44 : vector<1x512xf32> to vector<4x512xf32>
    %46 = arith.mulf %42, %45 : vector<4x512xf32>
    %c1_i32 = arith.constant 1 : i32
    %47 = tpu.dynamic_rotate %1 by %c1_i32 dim 1 : vector<4x512xf32>, i32 -> vector<4x512xf32>
    %48 = vector.extract_strided_slice %3 {offsets = [2, 0, 0], sizes = [1, 1, 512], strides = [1, 1, 1]} : vector<7x1x512xf32> to vector<1x1x512xf32>
    %49 = vector.shape_cast %48 : vector<1x1x512xf32> to vector<1x512xf32>
    %50 = vector.broadcast %49 : vector<1x512xf32> to vector<4x512xf32>
    %51 = arith.mulf %47, %50 : vector<4x512xf32>
    %c511_i32 = arith.constant 511 : i32
    %52 = tpu.dynamic_rotate %1 by %c511_i32 dim 1 : vector<4x512xf32>, i32 -> vector<4x512xf32>
    %53 = vector.extract_strided_slice %3 {offsets = [4, 0, 0], sizes = [1, 1, 512], strides = [1, 1, 1]} : vector<7x1x512xf32> to vector<1x1x512xf32>
    %54 = vector.shape_cast %53 : vector<1x1x512xf32> to vector<1x512xf32>
    %55 = vector.broadcast %54 : vector<1x512xf32> to vector<4x512xf32>
    %56 = arith.mulf %52, %55 : vector<4x512xf32>
    %c510_i32 = arith.constant 510 : i32
    %57 = tpu.dynamic_rotate %1 by %c510_i32 dim 1 : vector<4x512xf32>, i32 -> vector<4x512xf32>
    %58 = vector.extract_strided_slice %3 {offsets = [5, 0, 0], sizes = [1, 1, 512], strides = [1, 1, 1]} : vector<7x1x512xf32> to vector<1x1x512xf32>
    %59 = vector.shape_cast %58 : vector<1x1x512xf32> to vector<1x512xf32>
    %60 = vector.broadcast %59 : vector<1x512xf32> to vector<4x512xf32>
    %61 = arith.mulf %57, %60 : vector<4x512xf32>
    %c509_i32 = arith.constant 509 : i32
    %62 = tpu.dynamic_rotate %1 by %c509_i32 dim 1 : vector<4x512xf32>, i32 -> vector<4x512xf32>
    %63 = vector.extract_strided_slice %3 {offsets = [6, 0, 0], sizes = [1, 1, 512], strides = [1, 1, 1]} : vector<7x1x512xf32> to vector<1x1x512xf32>
    %64 = vector.shape_cast %63 : vector<1x1x512xf32> to vector<1x512xf32>
    %65 = vector.broadcast %64 : vector<1x512xf32> to vector<4x512xf32>
    %66 = arith.mulf %62, %65 : vector<4x512xf32>
    %67 = tpu.concatenate %11, %16, %21, %1, %26, %31, %36, %41, %46, %51, %1, %56, %61, %66, %6 in 0 : vector<4x512xf32>, vector<4x512xf32>, vector<4x512xf32>, vector<4x512xf32>, vector<4x512xf32>, vector<4x512xf32>, vector<4x512xf32>, vector<4x512xf32>, vector<4x512xf32>, vector<4x512xf32>, vector<4x512xf32>, vector<4x512xf32>, vector<4x512xf32>, vector<4x512xf32>, vector<1x512xf32> -> vector<57x512xf32>
    %68 = arith.truncf %67 : vector<57x512xf32> to vector<57x512xbf16>
    %cst_12 = arith.constant dense<0.000000e+00> : vector<16x512xf32>
    %69 = tpu.matmul %4, %68, %cst_12 {dimension_numbers = #tpu.dot_dimension_numbers<[1], [0], [0], [1], [0, 0, 1, 1], [], []>} : vector<16x57xbf16>, vector<57x512xbf16>, vector<16x512xf32> -> vector<16x512xf32>
    %70 = vector.extract_strided_slice %69 {offsets = [0, 0], sizes = [8, 512], strides = [1, 1]} : vector<16x512xf32> to vector<8x512xf32>
    %71 = vector.extract_strided_slice %69 {offsets = [8, 0], sizes = [8, 512], strides = [1, 1]} : vector<16x512xf32> to vector<8x512xf32>
    %cst_13 = arith.constant 0.000000e+00 : f32
    %72 = vector.broadcast %cst_13 : f32 to vector<8x512xf32>
    %73 = arith.maximumf %71, %72 : vector<8x512xf32>
    %c3_i32_14 = arith.constant 3 : i32
    %74 = tpu.dynamic_rotate %70 by %c3_i32_14 dim 1 : vector<8x512xf32>, i32 -> vector<8x512xf32>
    %75 = vector.extract_strided_slice %3 {offsets = [0, 0, 0], sizes = [1, 1, 512], strides = [1, 1, 1]} : vector<7x1x512xf32> to vector<1x1x512xf32>
    %76 = vector.shape_cast %75 : vector<1x1x512xf32> to vector<1x512xf32>
    %77 = vector.broadcast %76 : vector<1x512xf32> to vector<8x512xf32>
    %78 = arith.mulf %74, %77 : vector<8x512xf32>
    %c2_i32_15 = arith.constant 2 : i32
    %79 = tpu.dynamic_rotate %70 by %c2_i32_15 dim 1 : vector<8x512xf32>, i32 -> vector<8x512xf32>
    %80 = vector.extract_strided_slice %3 {offsets = [1, 0, 0], sizes = [1, 1, 512], strides = [1, 1, 1]} : vector<7x1x512xf32> to vector<1x1x512xf32>
    %81 = vector.shape_cast %80 : vector<1x1x512xf32> to vector<1x512xf32>
    %82 = vector.broadcast %81 : vector<1x512xf32> to vector<8x512xf32>
    %83 = arith.mulf %79, %82 : vector<8x512xf32>
    %c1_i32_16 = arith.constant 1 : i32
    %84 = tpu.dynamic_rotate %70 by %c1_i32_16 dim 1 : vector<8x512xf32>, i32 -> vector<8x512xf32>
    %85 = vector.extract_strided_slice %3 {offsets = [2, 0, 0], sizes = [1, 1, 512], strides = [1, 1, 1]} : vector<7x1x512xf32> to vector<1x1x512xf32>
    %86 = vector.shape_cast %85 : vector<1x1x512xf32> to vector<1x512xf32>
    %87 = vector.broadcast %86 : vector<1x512xf32> to vector<8x512xf32>
    %88 = arith.mulf %84, %87 : vector<8x512xf32>
    %c511_i32_17 = arith.constant 511 : i32
    %89 = tpu.dynamic_rotate %70 by %c511_i32_17 dim 1 : vector<8x512xf32>, i32 -> vector<8x512xf32>
    %90 = vector.extract_strided_slice %3 {offsets = [4, 0, 0], sizes = [1, 1, 512], strides = [1, 1, 1]} : vector<7x1x512xf32> to vector<1x1x512xf32>
    %91 = vector.shape_cast %90 : vector<1x1x512xf32> to vector<1x512xf32>
    %92 = vector.broadcast %91 : vector<1x512xf32> to vector<8x512xf32>
    %93 = arith.mulf %89, %92 : vector<8x512xf32>
    %c510_i32_18 = arith.constant 510 : i32
    %94 = tpu.dynamic_rotate %70 by %c510_i32_18 dim 1 : vector<8x512xf32>, i32 -> vector<8x512xf32>
    %95 = vector.extract_strided_slice %3 {offsets = [5, 0, 0], sizes = [1, 1, 512], strides = [1, 1, 1]} : vector<7x1x512xf32> to vector<1x1x512xf32>
    %96 = vector.shape_cast %95 : vector<1x1x512xf32> to vector<1x512xf32>
    %97 = vector.broadcast %96 : vector<1x512xf32> to vector<8x512xf32>
    %98 = arith.mulf %94, %97 : vector<8x512xf32>
    %c509_i32_19 = arith.constant 509 : i32
    %99 = tpu.dynamic_rotate %70 by %c509_i32_19 dim 1 : vector<8x512xf32>, i32 -> vector<8x512xf32>
    %100 = vector.extract_strided_slice %3 {offsets = [6, 0, 0], sizes = [1, 1, 512], strides = [1, 1, 1]} : vector<7x1x512xf32> to vector<1x1x512xf32>
    %101 = vector.shape_cast %100 : vector<1x1x512xf32> to vector<1x512xf32>
    %102 = vector.broadcast %101 : vector<1x512xf32> to vector<8x512xf32>
    %103 = arith.mulf %99, %102 : vector<8x512xf32>
    %c48_i32_20 = arith.constant 48 : i32
    %104 = tpu.dynamic_rotate %73 by %c48_i32_20 dim 1 : vector<8x512xf32>, i32 -> vector<8x512xf32>
    %105 = vector.extract_strided_slice %2 {offsets = [0, 0, 0], sizes = [1, 1, 512], strides = [1, 1, 1]} : vector<7x1x512xf32> to vector<1x1x512xf32>
    %106 = vector.shape_cast %105 : vector<1x1x512xf32> to vector<1x512xf32>
    %107 = vector.broadcast %106 : vector<1x512xf32> to vector<8x512xf32>
    %108 = arith.mulf %104, %107 : vector<8x512xf32>
    %c32_i32_21 = arith.constant 32 : i32
    %109 = tpu.dynamic_rotate %73 by %c32_i32_21 dim 1 : vector<8x512xf32>, i32 -> vector<8x512xf32>
    %110 = vector.extract_strided_slice %2 {offsets = [1, 0, 0], sizes = [1, 1, 512], strides = [1, 1, 1]} : vector<7x1x512xf32> to vector<1x1x512xf32>
    %111 = vector.shape_cast %110 : vector<1x1x512xf32> to vector<1x512xf32>
    %112 = vector.broadcast %111 : vector<1x512xf32> to vector<8x512xf32>
    %113 = arith.mulf %109, %112 : vector<8x512xf32>
    %c16_i32_22 = arith.constant 16 : i32
    %114 = tpu.dynamic_rotate %73 by %c16_i32_22 dim 1 : vector<8x512xf32>, i32 -> vector<8x512xf32>
    %115 = vector.extract_strided_slice %2 {offsets = [2, 0, 0], sizes = [1, 1, 512], strides = [1, 1, 1]} : vector<7x1x512xf32> to vector<1x1x512xf32>
    %116 = vector.shape_cast %115 : vector<1x1x512xf32> to vector<1x512xf32>
    %117 = vector.broadcast %116 : vector<1x512xf32> to vector<8x512xf32>
    %118 = arith.mulf %114, %117 : vector<8x512xf32>
    %c496_i32_23 = arith.constant 496 : i32
    %119 = tpu.dynamic_rotate %73 by %c496_i32_23 dim 1 : vector<8x512xf32>, i32 -> vector<8x512xf32>
    %120 = vector.extract_strided_slice %2 {offsets = [4, 0, 0], sizes = [1, 1, 512], strides = [1, 1, 1]} : vector<7x1x512xf32> to vector<1x1x512xf32>
    %121 = vector.shape_cast %120 : vector<1x1x512xf32> to vector<1x512xf32>
    %122 = vector.broadcast %121 : vector<1x512xf32> to vector<8x512xf32>
    %123 = arith.mulf %119, %122 : vector<8x512xf32>
    %c480_i32_24 = arith.constant 480 : i32
    %124 = tpu.dynamic_rotate %73 by %c480_i32_24 dim 1 : vector<8x512xf32>, i32 -> vector<8x512xf32>
    %125 = vector.extract_strided_slice %2 {offsets = [5, 0, 0], sizes = [1, 1, 512], strides = [1, 1, 1]} : vector<7x1x512xf32> to vector<1x1x512xf32>
    %126 = vector.shape_cast %125 : vector<1x1x512xf32> to vector<1x512xf32>
    %127 = vector.broadcast %126 : vector<1x512xf32> to vector<8x512xf32>
    %128 = arith.mulf %124, %127 : vector<8x512xf32>
    %c464_i32_25 = arith.constant 464 : i32
    %129 = tpu.dynamic_rotate %73 by %c464_i32_25 dim 1 : vector<8x512xf32>, i32 -> vector<8x512xf32>
    %130 = vector.extract_strided_slice %2 {offsets = [6, 0, 0], sizes = [1, 1, 512], strides = [1, 1, 1]} : vector<7x1x512xf32> to vector<1x1x512xf32>
    %131 = vector.shape_cast %130 : vector<1x1x512xf32> to vector<1x512xf32>
    %132 = vector.broadcast %131 : vector<1x512xf32> to vector<8x512xf32>
    %133 = arith.mulf %129, %132 : vector<8x512xf32>
    %134 = tpu.concatenate %78, %83, %88, %70, %93, %98, %103, %108, %113, %118, %73, %123, %128, %133, %6 in 0 : vector<8x512xf32>, vector<8x512xf32>, vector<8x512xf32>, vector<8x512xf32>, vector<8x512xf32>, vector<8x512xf32>, vector<8x512xf32>, vector<8x512xf32>, vector<8x512xf32>, vector<8x512xf32>, vector<8x512xf32>, vector<8x512xf32>, vector<8x512xf32>, vector<8x512xf32>, vector<1x512xf32> -> vector<113x512xf32>
    %135 = arith.truncf %134 : vector<113x512xf32> to vector<113x512xbf16>
    %cst_26 = arith.constant dense<0.000000e+00> : vector<8x512xf32>
    %136 = tpu.matmul %5, %135, %cst_26 {dimension_numbers = #tpu.dot_dimension_numbers<[1], [0], [0], [1], [0, 0, 1, 1], [], []>} : vector<8x113xbf16>, vector<113x512xbf16>, vector<8x512xf32> -> vector<8x512xf32>
    %c0_27 = arith.constant 0 : index
    %c0_28 = arith.constant 0 : index
    %c0_29 = arith.constant 0 : index
    %137 = vector.load %arg6[%c0_27, %c0_28, %c0_29] : memref<1x8x512xf32, #tpu.memory_space<vmem>>, vector<1x8x512xf32>
    %138 = vector.shape_cast %137 : vector<1x8x512xf32> to vector<8x512xf32>
    %139 = vector.shape_cast %136 : vector<8x512xf32> to vector<1x8x512xf32>
    tpu.vector_store %arg6[%c0_27, %c0_28, %c0_29], %139 {strides = array<i32>} : memref<1x8x512xf32, #tpu.memory_space<vmem>>, vector<1x8x512xf32>,
    return
  }
  func.func @transform_0(%arg0: i32) -> (i32, i32, i32) {
    %c0_i32 = arith.constant 0 : i32
    %c0_i32_0 = arith.constant 0 : i32
    %c0_i32_1 = arith.constant 0 : i32
    return %arg0, %c0_i32, %c0_i32_0 : i32, i32, i32
  }
  func.func @transform_1(%arg0: i32) -> (i32, i32, i32) {
    %c0_i32 = arith.constant 0 : i32
    %c0_i32_0 = arith.constant 0 : i32
    %c0_i32_1 = arith.constant 0 : i32
    %c0_i32_2 = arith.constant 0 : i32
    return %c0_i32, %c0_i32_0, %c0_i32_1 : i32, i32, i32
  }
  func.func @transform_2(%arg0: i32) -> (i32, i32, i32) {
    %c0_i32 = arith.constant 0 : i32
    %c0_i32_0 = arith.constant 0 : i32
    %c0_i32_1 = arith.constant 0 : i32
    %c0_i32_2 = arith.constant 0 : i32
    return %c0_i32, %c0_i32_0, %c0_i32_1 : i32, i32, i32
  }
  func.func @transform_3(%arg0: i32) -> (i32, i32) {
    %c0_i32 = arith.constant 0 : i32
    %c0_i32_0 = arith.constant 0 : i32
    %c0_i32_1 = arith.constant 0 : i32
    return %c0_i32, %c0_i32_0 : i32, i32
  }
  func.func @transform_4(%arg0: i32) -> (i32, i32) {
    %c0_i32 = arith.constant 0 : i32
    %c0_i32_0 = arith.constant 0 : i32
    %c0_i32_1 = arith.constant 0 : i32
    return %c0_i32, %c0_i32_0 : i32, i32
  }
  func.func @transform_5(%arg0: i32) -> (i32, i32, i32) {
    %c0_i32 = arith.constant 0 : i32
    %c0_i32_0 = arith.constant 0 : i32
    %c0_i32_1 = arith.constant 0 : i32
    return %arg0, %c0_i32, %c0_i32_0 : i32, i32, i32
  }
}

</mosaic_0001>

<bundles_post_ra>
// kernel: tpu_custom_call.1
= control target key start
LH: loop header
LB: loop body
LE: loop exit
PB: predicated region body
PF: predicated region fallthrough
CT: control target
= control target key end

     0   :  { %10 = vsyncpa [#allocation3], 0  ;;  %s2950_s0 = inlined_call_operand.hbm [shape: f32[2,4,512], index: 0, kind: input, shape index: {}]   ;;  %s2951_s1 = inlined_call_operand.hbm [shape: f32[7,1,512], index: 1, kind: input, shape index: {}]   ;;  %s2952_s2 = inlined_call_operand.hbm [shape: f32[7,1,512], index: 2, kind: input, shape index: {}]   ;;  %s2953_s3 = inlined_call_operand.hbm [shape: bf16[16,57], index: 3, kind: input, shape index: {}]   ;;  %s2954_s4 = inlined_call_operand.hbm [shape: bf16[8,113], index: 4, kind: input, shape index: {}]   ;;  %s2955_s5 = inlined_call_operand.hbm [shape: f32[2,8,512], index: 5, kind: output, shape index: {}]  }
   0x1   :  { %12 = vsyncpa [#allocation3 + $0x1], 0 }
   0x2   :  { %13 = vsyncpa [#allocation6], 0 }
   0x3   :  { %14 = vsyncpa [#allocation9], 0 }
   0x4   :  { %15 = vsyncpa [#allocation4], 0 }
   0x5   :  { %17 = vsyncpa [#allocation4 + $0x1], 0  ;;  %s1825_s18 = smov 0   ;;  %s1827_s19 = smov 0  }
   0x6   :  { %s1829_s20 = smov 0   ;;  %s1831_s21 = smov 0  }
   0x7 LB: > { %s175_s24 = sshll.u32 %s2951_s1, 4  ;;  %s1849_s25 = sadd.s32 4294967295, %s1773_s21   ;;  %s1773_s21 = sphi %s1831_s21, %s3084_s21   ;;  %s1769_s20 = sphi %s1829_s20, %s3083_s20   ;;  %s1765_s19 = sphi %s1827_s19, %s3082_s19   ;;  %s1761_s18 = sphi %s1825_s18, %s3081_s18   ;;  %s176_s24 = int_to_ptr.hbm [resolvable:$true] %s175_s24 }
   0x8   : > { %p1410_p0 = scmp.ge.s32.totalorder %s1773_s21, 1  ;;  %p44_p1 = scmp.eq.s32.totalorder %s1849_s25, 0 }
   0x9   : > { %p164_p2 = scmp.lt.s32.totalorder %s1773_s21, 3  ;;  %s1775_s27 = smov [#allocation5]  }
   0xa   : > { %s177_s28 = sshll.u32 %s1775_s27, 4  ;;  %s203_s6 = sshll.u32 %s2953_s3, 4  ;;  %s178_s28 = int_to_ptr.vmem [resolvable:$true] %s177_s28  ;;  %s204_s6 = int_to_ptr.hbm [resolvable:$true] %s203_s6 }
   0xb   : > { %p1854_p3 = pnand %p1410_p0, %p164_p2  ;;  %s189_s10 = sshll.u32 %s2952_s2, 4  ;;  %s190_s10 = int_to_ptr.hbm [resolvable:$true] %s189_s10 }
   0xc   : > { %s1776_s11 = smov [#allocation8]   ;;  %s1777_s13 = smov 64  }
   0xd   : > { %p1466_p4 = pneg %p1854_p3  ;;  %s205_s12 = sshll.u32 %s1776_s11, 4  ;;  %s206_s12 = int_to_ptr.vmem [resolvable:$true] %s205_s12 }
   0xe   : > { %s1778_s14 = smov 4   ;;  %s218_s17 = sshll.u32 %s2954_s4, 4  ;;  %s219_s17 = int_to_ptr.hbm [resolvable:$true] %s218_s17 }
   0xf   : > { %p1866_p6 = pnand %p1466_p4, %p44_p1  ;;  %s1779_s22 = smov [#allocation7]  }
  0x10   : > { %s191_s23 = sshll.u32 %s1779_s22, 4  ;;  %s1886_s29 = sadd.s32 1, %s1773_s21   ;;  %s192_s23 = int_to_ptr.vmem [resolvable:$true] %s191_s23 }
  0x11   : > { %1469 = dma.hbm_to_vmem [thread:$0]  (!%p1866_p6), %s176_s24, 448, %s178_s28, [#allocation6], %s1777_s13, %s1777_s13, %s1778_s14  }
  0x12   : > { %1475 = dma.hbm_to_vmem [thread:$0]  (!%p1866_p6), %s204_s6, 128, %s206_s12, [#allocation9], %s1777_s13, %s1777_s13, %s1778_s14  }
  0x13   : > { %1472 = dma.hbm_to_vmem [thread:$0]  (!%p1866_p6), %s190_s10, 448, %s192_s23, [#allocation6], %s1777_s13, %s1777_s13, %s1778_s14  }
  0x14   : > { %s1780_s24 = smov [#allocation10]   ;;  %s1409_s28 = sadd.s32 4294967294, %s1773_s21  }
  0x15   : > { %s220_s27 = sshll.u32 %s1780_s24, 4  ;;  %s27_s30 = ssub.s32 %s1773_s21, %s1886_s29  ;;  %s221_s27 = int_to_ptr.vmem [resolvable:$true] %s220_s27 }
  0x16   : > { %1478 = dma.hbm_to_vmem [thread:$0]  (!%p1866_p6), %s219_s17, 64, %s221_s27, [#allocation9]  }
  0x17   : > { %s30_s6 = sadd.s32 1, %s1769_s20  ;;  %p28_p7 = scmp.eq.s32.totalorder %s27_s30, 0 }
  0x18   : > { %p37_p8 = scmp.ne.s32.totalorder %s1769_s20, %s1765_s19  ;;  %p38_p9 = scmp.eq.s32.totalorder %s1773_s21, 0 }
  0x19   : > { %p43_p10 = scmp.ne.s32.totalorder %s1765_s19, %s1761_s18  ;;  %p151_p13 = scmp.eq.s32.totalorder %s1849_s25, 1 }
  0x1a   : > { %s1897_s8 = scalar_select %p28_p7, %s1769_s20, %s30_s6  }
  0x1b   : > { %p1899_p11 = por %p38_p9, %p37_p8  ;;  %p1905_p12 = por %p44_p1, %p43_p10 }
  0x1c   : > { %p157_p0 = scmp.eq.s32.totalorder %s1409_s28, 1  ;;  %p1491_p2 = scmp.lt.s32.totalorder %s1773_s21, 2 }
  0x1d   : > { %s231_s10 = sand.u32 1, %s1769_s20   ;;  %p1912_p4 = por %p151_p13, %p37_p8 }
  0x1e   : > { %p1916_p6 = por %p157_p0, %p43_p10  ;;  %s1416_s13 = sshll.u32 %s231_s10, 4 }
  0x1f   : > { %s1443_s14 = sshll.u32 %s1773_s21, 4  ;;  %s235_s22 = scalar_lea.vmem [#allocation2], %s1416_s13 }
  0x20   : > { %s240_s17 = scalar_lea.hbm %s2950_s0, %s1443_s14  ;;  %s244_s23 = sshll.u32 %s235_s22, 4  ;;  %s245_s23 = int_to_ptr.vmem [resolvable:$true] %s244_s23 }
  0x21   : > { %s242_s24 = sshll.u32 %s240_s17, 4  ;;  %p1926_p7 = pnand %p1491_p2, %p1899_p11  ;;  %s243_s24 = int_to_ptr.hbm [resolvable:$true] %s242_s24 }
  0x22   : > { %s232_s28 = scalar_lea.sflag [#allocation3], %s231_s10  ;;  %s1669_s30 = sshra.s32 %s243_s24, 4  ;;  %s1670_s30 = int_to_ptr.hbm [resolvable:$true] %s1669_s30 }
  0x23   : > { %s1671_s6 = scalar_lea.hbm %s1670_s30, 16  ;;  %p1673_p9 = pneg %p1926_p7 }
  0x24   : > { %p1672_p8 = scmp.ne.s32.totalorder %s1670_s30, %s1671_s6  ;;  %s1676_s15 = scalar_lea.hbm %s2950_s0, 32 }
  0x25   : > { %p1677_p11 = scmp.lt.s32.totalorder %s1670_s30, %s2950_s0  ;;  %p1678_p0 = scmp.lt.s32.totalorder %s1676_s15, %s1671_s6 }
  0x26   : > { %p1674_p10 = pnand %p1673_p9, %p1672_p8 }
  0x27   : > { %p1679_p2 = por %p1678_p0, %p1677_p11 }
  0x28   : > { %p1675_p13 = pneg %p1674_p10 }
  0x2a   : > { %p1680_p5 = pnand %p1679_p2, %p1675_p13 }
  0x2c   : > { %1683 = shalt.err (!%p1680_p5)
}
  0x2d   : > { %1482 = dma.hbm_to_vmem [thread:$0]  (!%p1926_p7), %s243_s24, 256, %s245_s23, %s232_s28  }
  0x2e   : > { %253 = sbr.rel (%p1854_p3) target bundleno = 831 (0x33f), region = 40 }
  0x33   : > { %s1943_s10 = sand.u32 1, %s1765_s19  }
  0x34   : > { %s1420_s17 = sshll.u32 %s1943_s10, 4  ;;  %s256_s22 = scalar_lea.sflag [#allocation3], %s1943_s10 }
  0x35   : > { %s259_s13 = scalar_lea.vmem [#allocation2], %s1420_s17 }
  0x36   : > { %1744 = dma.done.wait (%p1905_p12), %s256_s22, 256  }
  0x37   : > { %1746 = vsyncadd (%p1905_p12), %s256_s22, 4294967040 }
  0x38   : > { %1748 = dma.done.wait (%p44_p1), [#allocation6], 896  }
  0x39   : > { %1750 = vsyncadd (%p44_p1), [#allocation6], 4294966400 }
  0x3a   : > { %1752 = dma.done.wait (%p44_p1), [#allocation9], 192  }
  0x3b   : > { %1754 = vsyncadd (%p44_p1), [#allocation9], 4294967104  ;;  %v1959_v0 = vld [vmem:[%s259_s13 + $0x8] sm:$0xff]  ;;  %v1961_v1 = vld [vmem:[%s259_s13] sm:$0xff]  ;;  %s1781_s26 = smov 48   ;;  %s1782_s7 = smov 32   ;;  %v346_v57 = vlaneseq }
  0x3c   : > { %329 = vst [vmem:[#allocation1 + $0x10] ss:$2 sm:$0xff] %v1959_v0  ;;  %s1783_s23 = smov 16   ;;  %s1784_s24 = smov 112   ;;  %v2071_v62 = vld [vmem:[#allocation5 + $0x4] sm:$0xf] }
  0x3d   : > { %327 = vst [vmem:[#allocation1] ss:$2 sm:$0xff] %v1961_v1  ;;  %s1785_s27 = smov 96   ;;  %s1786_s28 = smov 80   ;;  %v2067_v60 = vand.u32 127, %v346_v57  ;;  %vm868_vm2 = vcmask 1043456  }
  0x3e   : > { %s1787_s30 = smov 3   ;;  %s1788_s6 = smov 2   ;;  %v2073_v63 = vld [vmem:[#allocation5] sm:$0xf]  ;;  %vm922_vm13 = vcmask 1044480   ;;  %vm918_vm14 = vcmask 465920  }
  0x3f   : > { %s1789_s14 = smov 1   ;;  %s1790_s15 = smov 127   ;;  %vm348_vm0 = vcmp.lt.s32.totalorder %v2067_v60, 48  ;;  %vm385_vm1 = vcmp.lt.s32.totalorder %v2067_v60, 32  ;;  %vm422_vm3 = vcmp.lt.s32.totalorder %v2067_v60, 16  ;;  %vm459_vm4 = vcmp.lt.s32.totalorder %v2067_v60, 112 }
  0x40   : > { %s1791_s16 = smov 126   ;;  %s1792_s9 = smov 125   ;;  %vm496_vm5 = vcmp.lt.s32.totalorder %v2067_v60, 96  ;;  %vm533_vm6 = vcmp.lt.s32.totalorder %v2067_v60, 80  ;;  %vm570_vm7 = vcmp.lt.s32.totalorder %v2067_v60, 3  ;;  %vm644_vm8 = vcmp.lt.s32.totalorder %v2067_v60, 1 }
  0x41   : > { %vm607_vm9 = vcmp.lt.s32.totalorder %v2067_v60, 2  ;;  %vm681_vm10 = vcmp.lt.s32.totalorder %v2067_v60, 127  ;;  %vm718_vm11 = vcmp.lt.s32.totalorder %v2067_v60, 126  ;;  %vm755_vm12 = vcmp.lt.s32.totalorder %v2067_v60, 125  ;;  %s1425_s17 = sshll.u32 %s1943_s10, 5  ;;  %s1445_s22 = sshll.u32 %s1849_s25, 5 }
  0x42   : > { %vm1222_vm15 = vcmask 1040384   ;;  %s1285_s25 = scalar_lea.sflag [#allocation4], %s1943_s10 }
  0x43   : > { %v333_v2 = vld.sshfl [vmem:[#allocation1 + $0x18] sm:$0xff pattern:$0x75316420]  ;;  %v332_v3 = vld.sshfl [vmem:[#allocation1 + $0x10] sm:$0xff pattern:$0x75316420] }
  0x44   : > { %344 = vrot.lane.b32.xlu1 %v333_v2, %s1781_s26  ;;  %342 = vrot.lane.b32.xlu0 %v332_v3, %s1781_s26  ;;  %368 = vst [vmem:[#allocation1 + $0x10] ss:$2 sm:$0xff] %v1959_v0  ;;  %v331_v4 = vld.sshfl [vmem:[#allocation1 + $0x8] sm:$0xff pattern:$0x75316420]  ;;  %v2961_v3 = vperm.slane %v2071_v62, 2 }
  0x45   : > { %340 = vrot.lane.b32.xlu2 %v331_v4, %s1781_s26  ;;  %v1969_v5 = vld.sshfl [vmem:[#allocation1] sm:$0xff pattern:$0x75316420] }
  0x46   : > { %366 = vst [vmem:[#allocation1] ss:$2 sm:$0xff] %v1961_v1 }
  0x4b   : > { %v372_v6 = vld.sshfl [vmem:[#allocation1 + $0x18] sm:$0xff pattern:$0x75316420]  ;;  %v371_v7 = vld.sshfl [vmem:[#allocation1 + $0x10] sm:$0xff pattern:$0x75316420] }
  0x4c   : > { %383 = vrot.lane.b32.xlu0 %v372_v6, %s1782_s7  ;;  %405 = vst [vmem:[#allocation1 + $0x10] ss:$2 sm:$0xff] %v1959_v0 }
  0x4d   : > { %381 = vrot.lane.b32.xlu2 %v371_v7, %s1782_s7  ;;  %v370_v8 = vld.sshfl [vmem:[#allocation1 + $0x8] sm:$0xff pattern:$0x75316420]  ;;  %v1975_v9 = vld.sshfl [vmem:[#allocation1] sm:$0xff pattern:$0x75316420] }
  0x4e   : > { %379 = vrot.lane.b32.xlu1 %v370_v8, %s1782_s7  ;;  %403 = vst [vmem:[#allocation1] ss:$2 sm:$0xff] %v1961_v1  ;;  %v2958_v7 = vperm.slane %v2073_v63, 2 }
  0x53   : > { %v408_v10 = vld.sshfl [vmem:[#allocation1 + $0x10] sm:$0xff pattern:$0x75316420]  ;;  %v1979_v11 = vld.sshfl [vmem:[#allocation1 + $0x18] sm:$0xff pattern:$0x75316420] }
  0x54   : > { %418 = vrot.lane.b32.xlu0 %v408_v10, %s1783_s23  ;;  %442 = vst [vmem:[#allocation1 + $0x10] ss:$2 sm:$0xff] %v1959_v0 }
  0x55   : > { %v407_v12 = vld.sshfl [vmem:[#allocation1 + $0x8] sm:$0xff pattern:$0x75316420]  ;;  %v1983_v13 = vld.sshfl [vmem:[#allocation1] sm:$0xff pattern:$0x75316420] }
  0x56   : > { %416 = vrot.lane.b32.xlu2 %v407_v12, %s1783_s23  ;;  %440 = vst [vmem:[#allocation1] ss:$2 sm:$0xff] %v1961_v1 }
  0x5b   : > { %v445_v14 = vld.sshfl [vmem:[#allocation1 + $0x10] sm:$0xff pattern:$0x75316420]  ;;  %v446_v15 = vld.sshfl [vmem:[#allocation1 + $0x18] sm:$0xff pattern:$0x75316420] }
  0x5c   : > { %455 = vrot.lane.b32.xlu0 %v445_v14, %s1784_s24  ;;  %457 = vrot.lane.b32.xlu1 %v446_v15, %s1784_s24  ;;  %479 = vst [vmem:[#allocation1 + $0x10] ss:$2 sm:$0xff] %v1959_v0 }
  0x5d   : > { %v443_v16 = vld.sshfl [vmem:[#allocation1] sm:$0xff pattern:$0x75316420]  ;;  %v1990_v17 = vld.sshfl [vmem:[#allocation1 + $0x8] sm:$0xff pattern:$0x75316420] }
  0x5e   : > { %451 = vrot.lane.b32.xlu2 %v443_v16, %s1784_s24  ;;  %477 = vst [vmem:[#allocation1] ss:$2 sm:$0xff] %v1961_v1 }
  0x63   : > { %v482_v18 = vld.sshfl [vmem:[#allocation1 + $0x10] sm:$0xff pattern:$0x75316420]  ;;  %v483_v19 = vld.sshfl [vmem:[#allocation1 + $0x18] sm:$0xff pattern:$0x75316420] }
  0x64   : > { %492 = vrot.lane.b32.xlu0 %v482_v18, %s1785_s27  ;;  %494 = vrot.lane.b32.xlu1 %v483_v19, %s1785_s27  ;;  %516 = vst [vmem:[#allocation1 + $0x10] ss:$2 sm:$0xff] %v1959_v0 }
  0x65   : > { %v480_v20 = vld.sshfl [vmem:[#allocation1] sm:$0xff pattern:$0x75316420]  ;;  %v1997_v21 = vld.sshfl [vmem:[#allocation1 + $0x8] sm:$0xff pattern:$0x75316420] }
  0x66   : > { %488 = vrot.lane.b32.xlu2 %v480_v20, %s1785_s27  ;;  %514 = vst [vmem:[#allocation1] ss:$2 sm:$0xff] %v1961_v1 }
  0x6b   : > { %v519_v22 = vld.sshfl [vmem:[#allocation1 + $0x10] sm:$0xff pattern:$0x75316420]  ;;  %v520_v23 = vld.sshfl [vmem:[#allocation1 + $0x18] sm:$0xff pattern:$0x75316420] }
  0x6c   : > { %529 = vrot.lane.b32.xlu0 %v519_v22, %s1786_s28  ;;  %531 = vrot.lane.b32.xlu1 %v520_v23, %s1786_s28  ;;  %553 = vst [vmem:[#allocation1 + $0x10] ss:$2 sm:$0xff] %v1959_v0 }
  0x6d   : > { %v517_v24 = vld.sshfl [vmem:[#allocation1] sm:$0xff pattern:$0x75316420]  ;;  %v2004_v25 = vld.sshfl [vmem:[#allocation1 + $0x8] sm:$0xff pattern:$0x75316420] }
  0x6e   : > { %525 = vrot.lane.b32.xlu2 %v517_v24, %s1786_s28  ;;  %551 = vst [vmem:[#allocation1] ss:$2 sm:$0xff] %v1961_v1 }
  0x73   : > { %v556_v26 = vld.sshfl [vmem:[#allocation1 + $0x10] sm:$0xff pattern:$0x75316420]  ;;  %v557_v27 = vld.sshfl [vmem:[#allocation1 + $0x18] sm:$0xff pattern:$0x75316420] }
  0x74   : > { %566 = vrot.lane.b32.xlu0 %v556_v26, %s1787_s30  ;;  %568 = vrot.lane.b32.xlu1 %v557_v27, %s1787_s30  ;;  %590 = vst [vmem:[#allocation1 + $0x10] ss:$2 sm:$0xff] %v1959_v0 }
  0x75   : > { %v555_v28 = vld.sshfl [vmem:[#allocation1 + $0x8] sm:$0xff pattern:$0x75316420]  ;;  %v2011_v29 = vld.sshfl [vmem:[#allocation1] sm:$0xff pattern:$0x75316420] }
  0x76   : > { %564 = vrot.lane.b32.xlu2 %v555_v28, %s1787_s30  ;;  %588 = vst [vmem:[#allocation1] ss:$2 sm:$0xff] %v1961_v1 }
  0x7b   : > { %v594_v30 = vld.sshfl [vmem:[#allocation1 + $0x18] sm:$0xff pattern:$0x75316420]  ;;  %v593_v31 = vld.sshfl [vmem:[#allocation1 + $0x10] sm:$0xff pattern:$0x75316420] }
  0x7c   : > { %605 = vrot.lane.b32.xlu0 %v594_v30, %s1788_s6  ;;  %627 = vst [vmem:[#allocation1 + $0x10] ss:$2 sm:$0xff] %v1959_v0  ;;  %v2144_v30 = vld [vmem:[#allocation5 + $0x10] sm:$0xf] }
  0x7d   : > { %v592_v32 = vld.sshfl [vmem:[#allocation1 + $0x8] sm:$0xff pattern:$0x75316420]  ;;  %v591_v33 = vld.sshfl [vmem:[#allocation1] sm:$0xff pattern:$0x75316420] }
  0x7e   : > { %603 = vrot.lane.b32.xlu2 %v593_v31, %s1788_s6  ;;  %601 = vrot.lane.b32.xlu1 %v592_v32, %s1788_s6  ;;  %625 = vst [vmem:[#allocation1] ss:$2 sm:$0xff] %v1961_v1 }
  0x83   : > { %v631_v34 = vld.sshfl [vmem:[#allocation1 + $0x18] sm:$0xff pattern:$0x75316420]  ;;  %v630_v35 = vld.sshfl [vmem:[#allocation1 + $0x10] sm:$0xff pattern:$0x75316420] }
  0x84   : > { %664 = vst [vmem:[#allocation1 + $0x10] ss:$2 sm:$0xff] %v1959_v0 }
  0x85   : > { %v629_v36 = vld.sshfl [vmem:[#allocation1 + $0x8] sm:$0xff pattern:$0x75316420]  ;;  %v628_v37 = vld.sshfl [vmem:[#allocation1] sm:$0xff pattern:$0x75316420] }
  0x86   : > { %642 = vrot.lane.b32.xlu2 %v631_v34, %s1789_s14  ;;  %599 = vrot.lane.b32.xlu1 %v591_v33, %s1788_s6  ;;  %662 = vst [vmem:[#allocation1] ss:$2 sm:$0xff] %v1961_v1  ;;  %v2963_v34 = vperm.slane %v2144_v30, 2 }
  0x87   : > { %638 = vrot.lane.b32.xlu0 %v629_v36, %s1789_s14 }
  0x8b   : > { %v667_v38 = vld.sshfl [vmem:[#allocation1 + $0x10] sm:$0xff pattern:$0x75316420]  ;;  %v668_v39 = vld.sshfl [vmem:[#allocation1 + $0x18] sm:$0xff pattern:$0x75316420] }
  0x8c   : > { %701 = vst [vmem:[#allocation1 + $0x10] ss:$2 sm:$0xff] %v1959_v0 }
  0x8d   : > { %v665_v40 = vld.sshfl [vmem:[#allocation1] sm:$0xff pattern:$0x75316420]  ;;  %v666_v41 = vld.sshfl [vmem:[#allocation1 + $0x8] sm:$0xff pattern:$0x75316420] }
  0x8e   : > { %640 = vrot.lane.b32.xlu1 %v630_v35, %s1789_s14  ;;  %636 = vrot.lane.b32.xlu2 %v628_v37, %s1789_s14  ;;  %699 = vst [vmem:[#allocation1] ss:$2 sm:$0xff] %v1961_v1  ;;  %v2965_v35 = vperm.slane %v2144_v30, 3 }
  0x8f   : > { %673 = vrot.lane.b32.xlu0 %v665_v40, %s1790_s15 }
  0x93   : > { %v704_v42 = vld.sshfl [vmem:[#allocation1 + $0x10] sm:$0xff pattern:$0x75316420]  ;;  %v705_v43 = vld.sshfl [vmem:[#allocation1 + $0x18] sm:$0xff pattern:$0x75316420] }
  0x94   : > { %738 = vst [vmem:[#allocation1 + $0x10] ss:$2 sm:$0xff] %v1959_v0 }
  0x95   : > { %v703_v44 = vld.sshfl [vmem:[#allocation1 + $0x8] sm:$0xff pattern:$0x75316420]  ;;  %v702_v45 = vld.sshfl [vmem:[#allocation1] sm:$0xff pattern:$0x75316420] }
  0x96   : > { %677 = vrot.lane.b32.xlu1 %v667_v38, %s1790_s15  ;;  %679 = vrot.lane.b32.xlu2 %v668_v39, %s1790_s15  ;;  %736 = vst [vmem:[#allocation1] ss:$2 sm:$0xff] %v1961_v1 }
  0x97   : > { %675 = vrot.lane.b32.xlu0 %v666_v41, %s1790_s15 }
  0x9b   : > { %v741_v46 = vld.sshfl [vmem:[#allocation1 + $0x10] sm:$0xff pattern:$0x75316420]  ;;  %v742_v47 = vld.sshfl [vmem:[#allocation1 + $0x18] sm:$0xff pattern:$0x75316420] }
  0x9c   : > { %788 = vst [vmem:[#allocation1 + $0x11] ss:$2 sm:$0xff] %v1959_v0 }
  0x9d   : > { %v739_v48 = vld.sshfl [vmem:[#allocation1] sm:$0xff pattern:$0x75316420]  ;;  %v740_v49 = vld.sshfl [vmem:[#allocation1 + $0x8] sm:$0xff pattern:$0x75316420] }
  0x9e   : > { %714 = vrot.lane.b32.xlu2 %v704_v42, %s1791_s16  ;;  %710 = vrot.lane.b32.xlu1 %v702_v45, %s1791_s16  ;;  %786 = vst [vmem:[#allocation1 + $0x1] ss:$2 sm:$0xff] %v1961_v1 }
  0x9f   : > { %747 = vrot.lane.b32.xlu0 %v739_v48, %s1792_s9  ;;  %v2040_v50 = vpop.permute.xlu2 %340 }
  0xa0   : > { %2996 = vst [vmem:[#allocation16_spill] sm:$0xff] %v2040_v50 }
  0xa3   : > { %v791_v51 = vld.sshfl [vmem:[#allocation1 + $0x10] sm:$0xff pattern:$0x75316420]  ;;  %v2042_v52 = vld.sshfl [vmem:[#allocation1 + $0x18] sm:$0xff pattern:$0x75316420] }
  0xa4   : > { %835 = vst [vmem:[#allocation1 + $0x10] ss:$2 sm:$0xff] %v1959_v0  ;;  %v2962_v0 = vperm.slane %v2071_v62, 3 }
  0xa5   : > { %v2045_v53 = vld.sshfl [vmem:[#allocation1] sm:$0xff pattern:$0x75316420]  ;;  %v2047_v54 = vld.sshfl [vmem:[#allocation1 + $0x8] sm:$0xff pattern:$0x75316420] }
  0xa6   : > { %2997 = vst [vmem:[#allocation17_spill] sm:$0xff] %v2045_v53  ;;  %716 = vrot.lane.b32.xlu2 %v705_v43, %s1791_s16  ;;  %712 = vrot.lane.b32.xlu1 %v703_v44, %s1791_s16 }
  0xa7   : > { %2998 = vst [vmem:[#allocation18_spill] sm:$0xff] %v2047_v54  ;;  %751 = vrot.lane.b32.xlu0 %v741_v46, %s1792_s9  ;;  %v382_v55 = vpop.permute.xlu2 %381 }
  0xa8   : > { %833 = vst [vmem:[#allocation1] ss:$2 sm:$0xff] %v1961_v1  ;;  %v2959_v1 = vperm.slane %v2073_v63, 3 }
  0xae   : > { %490 = vrot.lane.b32.xlu2 %v1997_v21, %s1785_s27  ;;  %753 = vrot.lane.b32.xlu1 %v742_v47, %s1792_s9 }
  0xaf   : > { %749 = vrot.lane.b32.xlu0 %v740_v49, %s1792_s9 }
  0xb0   : > { %v2057_v56 = vpop.permute.xlu2 %416 }
  0xb6   : > { %527 = vrot.lane.b32.xlu2 %v2004_v25, %s1786_s28  ;;  %420 = vrot.lane.b32.xlu1 %v1979_v11, %s1783_s23  ;;  %v2063_v58 = vpop.permute.xlu1 %344  ;;  %v343_v59 = vpop.permute.xlu0 %342 }
  0xb7   : > { %2999 = vst [vmem:[#allocation19_spill] sm:$0xff] %v2063_v58  ;;  %562 = vrot.lane.b32.xlu0 %v2011_v29, %s1787_s30  ;;  %v349_v4 = vsel %vm348_vm0, %v343_v59, %v2063_v58  ;;  %v350_v11 = vsel %vm348_vm0, %v2040_v50, %v343_v59  ;;  %v2142_v29 = vld [vmem:[#allocation5 + $0x14] sm:$0xf] }
  0xb8   : > { %v2069_v61 = vpop.permute.xlu2 %451  ;;  %v365_v14 = vmul.f32 %v2959_v1, %v349_v4  ;;  %v2966_v31 = vperm.slane %v2142_v29, 2  ;;  %v2968_v32 = vperm.slane %v2142_v29, 3  ;;  %v2190_v4 = vld [vmem:[#allocation7] sm:$0xf] }
  0xbe   : > { %414 = vrot.lane.b32.xlu2 %v1983_v13, %s1783_s23  ;;  %453 = vrot.lane.b32.xlu1 %v1990_v17, %s1784_s24  ;;  %v2083_v2 = vpop.permute.xlu0 %383  ;;  %v2107_v13 = vld [vmem:[#allocation5 + $0x8] sm:$0xf]  ;;  %v364_v17 = vmul.f32 %v2958_v7, %v350_v11  ;;  %v2957_v11 = vperm.slane %v2190_v4, 3  ;;  %v2247_v7 = vld [vmem:[#allocation7 + $0x10] sm:$0xf] }
  0xbf   : > { %377 = vrot.lane.b32.xlu0 %v1975_v9, %s1782_s7  ;;  %v386_v6 = vsel %vm385_vm1, %v382_v55, %v2083_v2  ;;  %v2960_v19 = vperm.slane %v2107_v13, 2  ;;  %3002 = vst [vmem:[#allocation22_spill] sm:$0xff] %v2247_v7 }
  0xc0   : > { %v402_v8 = vmul.f32 %v2962_v0, %v386_v6  ;;  %v2097_v10 = vpop.permute.xlu1 %379  ;;  %v2105_v9 = vpop.permute.xlu2 %488  ;;  %v2192_v6 = vld [vmem:[#allocation5 + $0x18] sm:$0xf] }
  0xc1   : > { %v387_v12 = vsel %vm385_vm1, %v2097_v10, %v382_v55 }
  0xc2   : > { %v780_v15 = vrot.slane %v402_v8, 4  ;;  %v401_v16 = vmul.f32 %v2961_v3, %v387_v12  ;;  %v2956_v8 = vperm.slane %v2190_v4, 2  ;;  %v2964_v12 = vperm.slane %v2192_v6, 2 }
  0xc4   : > { %v779_v18 = vrot.slane %v401_v16, 4  ;;  %v2118_v20 = vsel %vm868_vm2, %v365_v14, %v780_v15  ;;  %v2967_v14 = vperm.slane %v2192_v6, 3 }
  0xc6   : > { %338 = vrot.lane.b32.xlu1 %v1969_v5, %s1781_s26  ;;  %v2122_v21 = vpop.permute.xlu0 %418  ;;  %v2125_v22 = vsel %vm868_vm2, %v364_v17, %v779_v18 }
  0xc7   : > { %v424_v23 = vsel %vm422_vm3, %v2057_v56, %v2122_v21 }
  0xc8   : > { %v438_v24 = vmul.f32 %v2960_v19, %v424_v23  ;;  %v2136_v26 = vpop.permute.xlu2 %525 }
  0xca   : > { %v2134_v25 = vsel %vm868_vm2, %v438_v24, %v791_v51 }
  0xce   : > { %v2140_v27 = vpop.permute.xlu0 %455  ;;  %v458_v28 = vpop.permute.xlu1 %457 }
  0xcf   : > { %v460_v38 = vsel %vm459_vm4, %v2140_v27, %v458_v28  ;;  %v463_v39 = vsel %vm459_vm4, %v458_v28, %v2069_v61 }
  0xd0   : > { %v2150_v33 = vpop.permute.xlu2 %564  ;;  %v475_v44 = vmul.f32 %v2963_v34, %v460_v38  ;;  %v476_v45 = vmul.f32 %v2965_v35, %v463_v39 }
  0xd6   : > { %v2154_v36 = vpop.permute.xlu0 %492  ;;  %v495_v37 = vpop.permute.xlu1 %494 }
  0xd7   : > { %v497_v40 = vsel %vm496_vm5, %v2154_v36, %v495_v37  ;;  %v500_v41 = vsel %vm496_vm5, %v495_v37, %v2105_v9 }
  0xd8   : > { %v512_v42 = vmul.f32 %v2966_v31, %v497_v40  ;;  %v513_v43 = vmul.f32 %v2968_v32, %v500_v41  ;;  %v2188_v59 = vpop.permute.xlu2 %603 }
  0xda   : > { %v803_v46 = vrot.slane %v512_v42, 4  ;;  %v804_v47 = vrot.slane %v513_v43, 4 }
  0xdc   : > { %v2178_v48 = vsel %vm868_vm2, %v475_v44, %v803_v46  ;;  %v2181_v49 = vsel %vm868_vm2, %v476_v45, %v804_v47  ;;  %v2266_v44 = vld [vmem:[#allocation7 + $0x14] sm:$0xf] }
  0xde   : > { %v2183_v51 = vpop.permute.xlu0 %529  ;;  %v532_v55 = vpop.permute.xlu1 %531 }
  0xdf   : > { %v534_v57 = vsel %vm533_vm6, %v2183_v51, %v532_v55  ;;  %v537_v17 = vsel %vm533_vm6, %v532_v55, %v2136_v26 }
  0xe0   : > { %v549_v37 = vmul.f32 %v2964_v12, %v534_v57  ;;  %v550_v38 = vmul.f32 %v2967_v14, %v537_v17  ;;  %v643_v39 = vpop.permute.xlu2 %642 }
  0xe6   : > { %v567_v15 = vpop.permute.xlu0 %566  ;;  %v2199_v16 = vpop.permute.xlu1 %568 }
  0xe7   : > { %v572_v18 = vsel %vm570_vm7, %v2150_v33, %v567_v15  ;;  %v571_v23 = vsel %vm570_vm7, %v567_v15, %v2199_v16 }
  0xe8   : > { %v586_v24 = vmul.f32 %v2956_v8, %v572_v18  ;;  %v587_v28 = vmul.f32 %v2957_v11, %v571_v23  ;;  %v637_v55 = vpop.permute.xlu2 %636 }
  0xe9   : > { %v648_v8 = vsel %vm644_vm8, %v643_v39, %v637_v55 }
  0xea   : > { %v815_v40 = vrot.slane %v586_v24, 4  ;;  %v816_v41 = vrot.slane %v587_v28, 4 }
  0xec   : > { %v2219_v42 = vsel %vm868_vm2, %v549_v37, %v815_v40  ;;  %v2222_v43 = vsel %vm868_vm2, %v550_v38, %v816_v41  ;;  %v2238_v38 = vld [vmem:[#allocation7 + $0x8] sm:$0xf]  ;;  %v2241_v40 = vld [vmem:[#allocation7 + $0x4] sm:$0xf] }
  0xed   : > { %3000 = vst [vmem:[#allocation20_spill] sm:$0xff] %v2238_v38  ;;  %v2969_v41 = vperm.slane %v2238_v38, 0  ;;  %v2970_v11 = vperm.slane %v2238_v38, 1  ;;  %v2972_v12 = vperm.slane %v2241_v40, 0  ;;  %v2971_v31 = vperm.slane %v2238_v38, 2 }
  0xee   : > { %v606_v46 = vpop.permute.xlu0 %605  ;;  %3001 = vst [vmem:[#allocation21_spill] sm:$0xff] %v2241_v40 }
  0xef   : > { %v658_v5 = vmul.f32 %v2969_v41, %v648_v8 }
  0xf0   : > { %v602_v47 = vpop.permute.xlu1 %601  ;;  %v2228_v17 = vpop.permute.xlu2 %679 }
  0xf1   : > { %v825_v14 = vrot.slane %v658_v5, 4  ;;  %v2301_v5 = vld [vmem:[#allocation7 + $0x18] sm:$0xf] }
  0xf2   : > { %3003 = vst [vmem:[#allocation23_spill] sm:$0xff] %v2301_v5 }
  0xf8   : > { %v600_v57 = vpop.permute.xlu1 %599  ;;  %v2232_v24 = vpop.permute.xlu2 %714 }
  0xf9   : > { %v639_v15 = vpop.permute.xlu0 %638  ;;  %v611_v8 = vsel %vm607_vm9, %v606_v46, %v600_v57 }
  0xfa   : > { %v647_v0 = vsel %vm644_vm8, %v637_v55, %v639_v15  ;;  %v608_v55 = vsel %vm607_vm9, %v2188_v59, %v606_v46  ;;  %v3006_v46 = vperm.slane %v2241_v40, 1 }
  0xfb   : > { %v659_v35 = vmul.f32 %v2970_v11, %v647_v0  ;;  %v609_v0 = vsel %vm607_vm9, %v602_v47, %v2188_v59  ;;  %v610_v11 = vsel %vm607_vm9, %v600_v57, %v602_v47  ;;  %v621_v59 = vmul.f32 %v2972_v12, %v611_v8 }
  0xfc   : > { %v622_v53 = vmul.f32 %v3006_v46, %v610_v11  ;;  %v3007_v12 = vperm.slane %v2238_v38, 3  ;;  %v2983_v8 = vperm.slane %v2301_v5, 1 }
  0xfd   : > { %v826_v19 = vrot.slane %v659_v35, 4 }
  0xff   : > { %v2338_v46 = vsel %vm868_vm2, %v622_v53, %v826_v19 }
 0x100   : > { %v641_v18 = vpop.permute.xlu1 %640  ;;  %v717_v32 = vpop.permute.xlu2 %716 }
 0x101   : > { %v2230_v23 = vpop.permute.xlu0 %673  ;;  %v646_v45 = vsel %vm644_vm8, %v639_v15, %v641_v18  ;;  %v645_v41 = vsel %vm644_vm8, %v641_v18, %v643_v39  ;;  %v3004_v39 = vperm.slane %v2241_v40, 3  ;;  %v719_v58 = vsel %vm718_vm11, %v2232_v24, %v717_v32 }
 0x102   : > { %v660_v3 = vmul.f32 %v2971_v31, %v646_v45  ;;  %v685_v15 = vsel %vm681_vm10, %v2228_v17, %v2230_v23  ;;  %v3005_v31 = vperm.slane %v2241_v40, 2  ;;  %v2314_v47 = vmul.f32 %v3007_v12, %v645_v41 }
 0x103   : > { %v2305_v18 = vmul.f32 %v3004_v39, %v608_v55  ;;  %v3008_v55 = vperm.slane %v2247_v7, 3  ;;  %v1793_v40 = vmov 65535  }
 0x104   : > { %v623_v54 = vmul.f32 %v3005_v31, %v609_v0  ;;  %v827_v57 = vrot.slane %v660_v3, 4  ;;  %v2976_v0 = vperm.slane %v2301_v5, 2  ;;  %v828_v41 = vrot.slane %v2314_v47, 4 }
 0x105   : > { %v2321_v39 = vmul.f32 %v3008_v55, %v685_v15  ;;  %v2335_v15 = vsel %vm868_vm2, %v621_v59, %v825_v14  ;;  %v3009_v55 = vperm.slane %v2266_v44, 2 }
 0x106   : > { %v2352_v53 = vsel %vm868_vm2, %v623_v54, %v827_v57 }
 0x107   : > { %v734_v11 = vmul.f32 %v3009_v55, %v719_v58  ;;  %v851_v14 = vrot.slane %v2321_v39, 4  ;;  %v3010_v58 = vperm.slane %v2247_v7, 2  ;;  %v3011_v39 = vperm.slane %v2247_v7, 1 }
 0x108   : > { %v2234_v28 = vpop.permute.xlu1 %677  ;;  %v2331_v12 = vpop.permute.xlu2 %490 }
 0x109   : > { %v2236_v37 = vpop.permute.xlu0 %675  ;;  %v682_v3 = vsel %vm681_vm10, %v2234_v28, %v2228_v17  ;;  %v2980_v17 = vperm.slane %v2301_v5, 0 }
 0x10a   : > { %v683_v31 = vsel %vm681_vm10, %v2236_v37, %v2234_v28  ;;  %v697_v19 = vmul.f32 %v3010_v58, %v682_v3  ;;  %v499_v28 = vsel %vm496_vm5, %v2105_v9, %v2331_v12  ;;  %v684_v47 = vsel %vm681_vm10, %v2230_v23, %v2236_v37 }
 0x10b   : > { %v696_v55 = vmul.f32 %v3011_v39, %v683_v31  ;;  %v3012_v39 = vperm.slane %v2301_v5, 3 }
 0x110   : > { %v2249_v1 = vpop.permute.xlu1 %710 }
 0x111   : > { %v2256_v34 = vpop.permute.xlu0 %747  ;;  %v722_v54 = vsel %vm718_vm11, %v717_v32, %v2249_v1 }
 0x118   : > { %v713_v45 = vpop.permute.xlu1 %712 }
 0x119   : > { %v752_v35 = vpop.permute.xlu0 %751  ;;  %v720_v9 = vsel %vm718_vm11, %v713_v45, %v2232_v24  ;;  %v721_v58 = vsel %vm718_vm11, %v2249_v1, %v713_v45  ;;  %v850_v45 = vrot.slane %v697_v19, 4 }
 0x120   : > { %v754_v57 = vpop.permute.xlu1 %753 }
 0x121   : > { %v756_v23 = vsel %vm755_vm12, %v752_v35, %v754_v57  ;;  %v759_v37 = vsel %vm755_vm12, %v754_v57, %v2256_v34  ;;  %v750_v31 = vpop.permute.xlu0 %749 }
 0x122   : > { %v771_v32 = vmul.f32 %v2976_v0, %v756_v23  ;;  %v772_v59 = vmul.f32 %v3012_v39, %v759_v37  ;;  %v757_v24 = vsel %vm755_vm12, %v750_v31, %v752_v35  ;;  %v758_v1 = vsel %vm755_vm12, %v2256_v34, %v750_v31 }
 0x123   : > { %v769_v3 = vmul.f32 %v2980_v17, %v758_v1  ;;  %v770_v57 = vmul.f32 %v2983_v8, %v757_v24  ;;  %v923_v23 = vsel %vm868_vm2, 4294967295, %v1793_v40  ;;  %v3013_v0 = vperm.slane %v2247_v7, 0  ;;  %v839_v24 = vld.sshfl [vmem:[#allocation1 + $0x18] sm:$0xff pattern:$0x75316420] }
 0x124   : > { %v3014_v39 = vperm.slane %v2266_v44, 3  ;;  %v862_v38 = vrot.slane %v771_v32, 4  ;;  %v863_v50 = vrot.slane %v772_v59, 4  ;;  %v3015_v34 = vperm.slane %v2266_v44, 0 }
 0x125   : > { %v695_v37 = vmul.f32 %v3013_v0, %v684_v47  ;;  %v3016_v31 = vperm.slane %v2266_v44, 1  ;;  %v860_v17 = vrot.slane %v769_v3, 4  ;;  %v861_v5 = vrot.slane %v770_v57, 4  ;;  %v837_v47 = vld.sshfl [vmem:[#allocation1 + $0x8] sm:$0xff pattern:$0x75316420] }
 0x126   : > { %v735_v35 = vmul.f32 %v3014_v39, %v722_v54  ;;  %v732_v19 = vmul.f32 %v3015_v34, %v721_v58  ;;  %v849_v8 = vrot.slane %v696_v55, 4  ;;  %v924_v40 = vsel %vm922_vm13, %v923_v23, 0  ;;  %v838_v39 = vld.sshfl [vmem:[#allocation1 + $0x10] sm:$0xff pattern:$0x75316420] }
 0x127   : > { %v733_v1 = vmul.f32 %v3016_v31, %v720_v9  ;;  %v895_v7 = vsel %vm868_vm2, %v734_v11, %v862_v38  ;;  %v848_v34 = vrot.slane %v695_v37, 4  ;;  %v528_v9 = vpop.permute.xlu2 %527  ;;  %v2986_v55 = vperm.slane %v2190_v4, 1 }
 0x128   : > { %v896_v0 = vsel %vm868_vm2, %v735_v35, %v863_v50  ;;  %v893_v54 = vsel %vm868_vm2, %v732_v19, %v860_v17  ;;  %v911_v32 = vpack.c.bf16 1.0, %v895_v7  ;;  %v2408_v3 = vpop.permute.xlu1 %420  ;;  %v836_v50 = vld.sshfl [vmem:[#allocation1] sm:$0xff pattern:$0x75316420]  ;;  %v888_v17 = vsel %vm868_vm2, %v2305_v18, %v828_v41 }
 0x129   : > { %v894_v59 = vsel %vm868_vm2, %v733_v1, %v861_v5  ;;  %v912_v58 = vpack.c.bf16 1.0, %v896_v0  ;;  %v909_v57 = vpack.c.bf16 1.0, %v893_v54  ;;  %v563_v31 = vpop.permute.xlu0 %562  ;;  %v892_v5 = vsel %vm868_vm2, %v839_v24, %v851_v14 }
 0x12a   : > { %v910_v23 = vpack.c.bf16 1.0, %v894_v59  ;;  %v932_v38 = vand.u32 %v924_v40, %v911_v32  ;;  %v498_v7 = vsel %vm496_vm5, %v2331_v12, %v2154_v36  ;;  %v573_v37 = vsel %vm570_vm7, %v563_v31, %v2150_v33 }
 0x12b   : > { %v935_v11 = vand.u32 %v924_v40, %v912_v58  ;;  %v574_v35 = vsel %vm570_vm7, %v2199_v16, %v563_v31  ;;  %v891_v19 = vsel %vm868_vm2, %v838_v39, %v850_v45  ;;  %v3017_v1 = vperm.slane %v2142_v29, 0 }
 0x12c   : > { %v926_v41 = vand.u32 %v924_v40, %v909_v57  ;;  %v929_v14 = vand.u32 %v924_v40, %v910_v23  ;;  %969 = vmatpush.bf16.msra.mxu2 %v932_v38  ;;  %v890_v24 = vsel %vm868_vm2, %v837_v47, %v849_v8  ;;  %v423_v36 = vsel %vm422_vm3, %v2122_v21, %v2408_v3 }
 0x12d   : > { %v510_v18 = vmul.f32 %v3017_v1, %v499_v28  ;;  %v3018_v33 = vperm.slane %v2190_v4, 0  ;;  %v585_v16 = vmul.f32 %v2986_v55, %v573_v37  ;;  %983 = vmatpush.bf16.msra.mxu3 %v935_v11  ;;  %v889_v45 = vsel %vm868_vm2, %v836_v50, %v848_v34 }
 0x12e   : > { %v3019_v28 = vperm.slane %v2142_v29, 1  ;;  %v536_v8 = vsel %vm533_vm6, %v2136_v26, %v528_v9  ;;  %v429_v0 = vperm.slane %v2107_v13, 1  ;;  %941 = vmatpush.bf16.msra.mxu0 %v926_v41  ;;  %955 = vmatpush.bf16.msra.mxu1 %v929_v14  ;;  %v907_v21 = vpack.c.bf16 %v891_v19, %v2352_v53 }
 0x12f   : > { %v584_v12 = vmul.f32 %v3018_v33, %v574_v35  ;;  %v535_v47 = vsel %vm533_vm6, %v528_v9, %v2183_v51  ;;  %v908_v54 = vpack.c.bf16 %v892_v5, %v888_v17  ;;  %v465_v59 = vperm.slane %v2144_v30, 0 }
 0x130   : > { %v511_v40 = vmul.f32 %v3019_v28, %v498_v7  ;;  %v466_v32 = vperm.slane %v2144_v30, 1  ;;  %v2988_v58 = vperm.slane %v2107_v13, 0  ;;  %v3020_v39 = vperm.slane %v2107_v13, 3  ;;  %970 = vmatpush.bf16.msra.mxu2 %v907_v21  ;;  %v454_v38 = vpop.permute.xlu1 %453  ;;  %v415_v7 = vpop.permute.xlu2 %414  ;;  %v1444_v28 = vld [vmem:[#allocation8] sm:$0xff]  ;;  %v3026_v21 = vld [vmem:[#allocation16_spill] sm:$0xff] }
 0x131   : > { %v905_v34 = vpack.c.bf16 %v889_v45, %v2335_v15  ;;  %v906_v57 = vpack.c.bf16 %v890_v24, %v2338_v46  ;;  %v801_v53 = vrot.slane %v510_v18, 4  ;;  %v3021_v23 = vperm.slane %v2192_v6, 0  ;;  %984 = vmatpush.bf16.msra.mxu3 %v908_v54  ;;  %v378_v5 = vpop.permute.xlu0 %377 }
 0x132   : > { %v439_v26 = vmul.f32 %v3020_v39, %v423_v36  ;;  %v813_v51 = vrot.slane %v584_v12, 4  ;;  %v814_v9 = vrot.slane %v585_v16, 4  ;;  %v802_v11 = vrot.slane %v511_v40, 4 }
 0x133   : > { %v547_v31 = vmul.f32 %v3021_v23, %v536_v8  ;;  %v3022_v50 = vperm.slane %v2192_v6, 1  ;;  %942 = vmatpush.bf16.msra.mxu0 %v905_v34  ;;  %956 = vmatpush.bf16.msra.mxu1 %v906_v57  ;;  %v461_v15 = vsel %vm459_vm4, %v454_v38, %v2140_v27  ;;  %v462_v46 = vsel %vm459_vm4, %v2069_v61, %v454_v38  ;;  %v3028_v57 = vld [vmem:[#allocation17_spill] sm:$0xff] }
 0x134   : > { %v473_v37 = vmul.f32 %v465_v59, %v462_v46  ;;  %v474_v35 = vmul.f32 %v466_v32, %v461_v15  ;;  %v391_v19 = vperm.slane %v2071_v62, 0  ;;  %v392_v1 = vperm.slane %v2071_v62, 1 }
 0x135   : > { %v548_v17 = vmul.f32 %v3022_v50, %v535_v47  ;;  %v388_v27 = vsel %vm385_vm1, %v378_v5, %v2097_v10  ;;  %v389_v61 = vsel %vm385_vm1, %v2083_v2, %v378_v5  ;;  %v3023_v18 = vpack.c.bf16 %v2219_v42, %v2178_v48  ;;  %v3027_v47 = vld [vmem:[#allocation19_spill] sm:$0xff] }
 0x136   : > { %v876_v41 = vsel %vm868_vm2, %v439_v26, %v2042_v52  ;;  %v2987_v14 = vperm.slane %v2073_v63, 0  ;;  %v3024_v24 = vpack.c.bf16 %v2222_v43, %v2181_v49  ;;  %v877_v36 = vsel %vm868_vm2, %v473_v37, %v801_v53 }
 0x137   : > { %971 = vmatpush.bf16.msra.mxu2 %v3023_v18  ;;  %v881_v10 = vsel %vm868_vm2, %v547_v31, %v813_v51  ;;  %v878_v33 = vsel %vm868_vm2, %v474_v35, %v802_v11  ;;  %v882_v2 = vsel %vm868_vm2, %v548_v17, %v814_v9  ;;  %v425_v48 = vsel %vm422_vm3, %v415_v7, %v2057_v56  ;;  %v3029_v31 = vld [vmem:[#allocation18_spill] sm:$0xff] }
 0x138   : > { %985 = vmatpush.bf16.msra.mxu3 %v3024_v24  ;;  %v426_v52 = vsel %vm422_vm3, %v2408_v3, %v415_v7  ;;  %v901_v42 = vpack.c.bf16 %v881_v10, %v877_v36  ;;  %v902_v12 = vpack.c.bf16 %v882_v2, %v878_v33  ;;  %v399_v49 = vmul.f32 %v391_v19, %v389_v61  ;;  %v339_v8 = vpop.permute.xlu1 %338 }
 0x139   : > { %v400_v43 = vmul.f32 %v392_v1, %v388_v27  ;;  %v900_v16 = vpack.c.bf16 %v876_v41, %v2118_v20  ;;  %v355_v45 = vperm.slane %v2073_v63, 1  ;;  %v437_v56 = vmul.f32 %v429_v0, %v425_v48 }
 0x13a   : > { %943 = vmatpush.bf16.msra.mxu0 %v901_v42  ;;  %957 = vmatpush.bf16.msra.mxu1 %v902_v12  ;;  %v436_v3 = vmul.f32 %v2988_v58, %v426_v52  ;;  %v3025_v40 = vpack.c.bf16 %v2134_v25, %v2125_v22  ;;  %v351_v20 = vsel %vm348_vm0, %v339_v8, %v3026_v21  ;;  %v777_v39 = vrot.slane %v399_v49, 4 }
 0x13b   : > { %v352_v54 = vsel %vm348_vm0, %v3027_v47, %v339_v8  ;;  %v778_v26 = vrot.slane %v400_v43, 4  ;;  %v363_v22 = vmul.f32 %v355_v45, %v351_v20  ;;  %v874_v51 = vsel %vm868_vm2, %v437_v56, %v3029_v31 }
 0x13c   : > { %972 = vmatpush.bf16.msra.mxu2 %v3025_v40  ;;  %986 = vmatpush.bf16.msra.mxu3 %v900_v16  ;;  %v362_v34 = vmul.f32 %v2987_v14, %v352_v54  ;;  %v873_v53 = vsel %vm868_vm2, %v436_v3, %v3028_v57  ;;  %v3031_v3 = vld [vmem:[#allocation22_spill] sm:$0xff]  ;;  %v3042_v20 = vperm.slane %v2142_v29, 0 }
 0x13d   : > { %v870_v23 = vsel %vm868_vm2, %v363_v22, %v778_v26  ;;  %v3032_v40 = vperm.slane %v3031_v3, 0 }
 0x13e   : > { %v869_v25 = vsel %vm868_vm2, %v362_v34, %v777_v39  ;;  %v898_v38 = vpack.c.bf16 %v874_v51, %v870_v23 }
 0x13f   : > { %1432 = vmatmul.msk.bf16.vlgmr.msra.gmra.mxu2 %vm918_vm14, %v1444_v28  ;;  %1433 = vmatmul.msk.bf16.vlgmr.msra.gmra.mxu3 %vm918_vm14, %v1444_v28  ;;  %v897_v9 = vpack.c.bf16 %v873_v53, %v869_v25  ;;  %v3033_v25 = vperm.slane %v3031_v3, 1  ;;  %v3034_v53 = vperm.slane %v2266_v44, 1 }
 0x140   : > { %958 = vmatpush.bf16.msra.mxu1 %v898_v38 }
 0x141   : > { %944 = vmatpush.bf16.msra.mxu0 %v897_v9 }
 0x143   : > { %1431 = vmatmul.msk.bf16.vlgmr.msra.gmra.mxu1 %vm918_vm14, %v1444_v28 }
 0x144   : > { %1430 = vmatmul.msk.bf16.vlgmr.msra.gmra.mxu0 %vm918_vm14, %v1444_v28  ;;  %v3030_v28 = vperm.slane %v2266_v44, 0 }
 0x1c0   : > { %v2530_v50 = vpop.f32.mrf.mxu1 }
 0x1c1   : > { %v2528_v11 = vpop.f32.mrf.mxu0  ;;  %1031 = vrot.lane.b32.xlu1 %v2530_v50, %s1789_s14 }
 0x1c2   : > { %1045 = vrot.lane.b32.xlu2 %v2528_v11, %s1790_s15  ;;  %1077 = vrot.lane.b32.xlu0 %v2528_v11, %s1792_s9  ;;  %v2538_v17 = vpop.f32.mrf.mxu2  ;;  %v2552_v15 = vpop.f32.mrf.mxu3 }
 0x1c8   : > { %v962_v7 = vpop.f32.mrf.mxu1 }
 0x1c9   : > { %1047 = vrot.lane.b32.xlu1 %v2530_v50, %s1790_s15  ;;  %v948_v46 = vpop.f32.mrf.mxu0  ;;  %v2568_v37 = vmax.f32 %v962_v7, 0.0 }
 0x1ca   : > { %1061 = vrot.lane.b32.xlu2 %v2528_v11, %s1791_s16  ;;  %1049 = vrot.lane.b32.xlu0 %v2538_v17, %s1790_s15  ;;  %v2560_v5 = vmax.f32 %v948_v46, 0.0  ;;  %v976_v35 = vpop.f32.mrf.mxu2  ;;  %v990_v61 = vpop.f32.mrf.mxu3 }
 0x1cb   : > { %v2582_v27 = vmax.f32 %v976_v35, 0.0  ;;  %v2596_v18 = vmax.f32 %v990_v61, 0.0  ;;  %v1794_v35 = vmov 0  }
 0x1cc   : > { %v1224_v61 = vsel %vm1222_vm15, 65535, %v1794_v35 }
 0x1d1   : > { %1081 = vrot.lane.b32.xlu1 %v2538_v17, %s1792_s9 }
 0x1d2   : > { %1079 = vrot.lane.b32.xlu2 %v2530_v50, %s1792_s9  ;;  %1065 = vrot.lane.b32.xlu0 %v2538_v17, %s1791_s16 }
 0x1d9   : > { %1051 = vrot.lane.b32.xlu1 %v2552_v15, %s1790_s15  ;;  %s1719_s15 = scalar_lea.hbm %s2955_s5, 64 }
 0x1da   : > { %1063 = vrot.lane.b32.xlu2 %v2530_v50, %s1791_s16  ;;  %1035 = vrot.lane.b32.xlu0 %v2552_v15, %s1789_s14 }
 0x1e1   : > { %1067 = vrot.lane.b32.xlu1 %v2552_v15, %s1791_s16 }
 0x1e2   : > { %1083 = vrot.lane.b32.xlu2 %v2552_v15, %s1792_s9  ;;  %1157 = vrot.lane.b32.xlu0 %v2560_v5, %s1785_s27 }
 0x1e9   : > { %1175 = vrot.lane.b32.xlu1 %v2568_v37, %s1786_s28 }
 0x1ea   : > { %1033 = vrot.lane.b32.xlu2 %v2538_v17, %s1789_s14  ;;  %1173 = vrot.lane.b32.xlu0 %v2560_v5, %s1786_s28 }
 0x1f1   : > { %1125 = vrot.lane.b32.xlu1 %v2560_v5, %s1783_s23 }
 0x1f2   : > { %1111 = vrot.lane.b32.xlu2 %v2568_v37, %s1782_s7  ;;  %1141 = vrot.lane.b32.xlu0 %v2560_v5, %s1784_s24 }
 0x1f9   : > { %1161 = vrot.lane.b32.xlu1 %v2582_v27, %s1785_s27 }
 0x1fa   : > { %1127 = vrot.lane.b32.xlu2 %v2568_v37, %s1783_s23  ;;  %1159 = vrot.lane.b32.xlu0 %v2568_v37, %s1785_s27 }
 0x201   : > { %1177 = vrot.lane.b32.xlu1 %v2582_v27, %s1786_s28 }
 0x202   : > { %1143 = vrot.lane.b32.xlu2 %v2568_v37, %s1784_s24  ;;  %1095 = vrot.lane.b32.xlu0 %v2568_v37, %s1781_s26 }
 0x209   : > { %1145 = vrot.lane.b32.xlu1 %v2582_v27, %s1784_s24 }
 0x20a   : > { %1163 = vrot.lane.b32.xlu2 %v2596_v18, %s1785_s27  ;;  %1109 = vrot.lane.b32.xlu0 %v2560_v5, %s1782_s7 }
 0x211   : > { %1115 = vrot.lane.b32.xlu1 %v2596_v18, %s1782_s7 }
 0x212   : > { %1179 = vrot.lane.b32.xlu2 %v2596_v18, %s1786_s28  ;;  %1093 = vrot.lane.b32.xlu0 %v2560_v5, %s1781_s26 }
 0x219   : > { %1131 = vrot.lane.b32.xlu1 %v2596_v18, %s1783_s23 }
 0x21a   : > { %1147 = vrot.lane.b32.xlu2 %v2596_v18, %s1784_s24  ;;  %1113 = vrot.lane.b32.xlu0 %v2582_v27, %s1782_s7  ;;  %s1296_s7 = scalar_lea.hbm %s2955_s5, %s1445_s22 }
 0x21b   : > { %s1300_s27 = sshll.u32 %s1296_s7, 4  ;;  %s1301_s27 = int_to_ptr.hbm [resolvable:$true] %s1300_s27 }
 0x21c   : > { %v1046_v41 = vpop.permute.xlu2 %1045  ;;  %s1713_s28 = sshra.s32 %s1301_s27, 4  ;;  %s1714_s28 = int_to_ptr.hbm [resolvable:$true] %s1713_s28 }
 0x21d   : > { %p1720_p12 = scmp.lt.s32.totalorder %s1714_s28, %s2955_s5 }
 0x221   : > { %1097 = vrot.lane.b32.xlu1 %v2582_v27, %s1781_s26 }
 0x222   : > { %1099 = vrot.lane.b32.xlu2 %v2596_v18, %s1781_s26  ;;  %1129 = vrot.lane.b32.xlu0 %v2582_v27, %s1783_s23  ;;  %s306_s23 = scalar_lea.vmem [#allocation11], %s1425_s17 }
 0x223   : > { %s1298_s24 = sshll.u32 %s306_s23, 4  ;;  %s1299_s24 = int_to_ptr.vmem [resolvable:$true] %s1298_s24 }
 0x224   : > { %v1062_v24 = vpop.permute.xlu2 %1061 }
 0x229   : > { %1001 = vrot.lane.b32.xlu1 %v2538_v17, %s1787_s30 }
 0x22a   : > { %1003 = vrot.lane.b32.xlu2 %v2552_v15, %s1787_s30  ;;  %999 = vrot.lane.b32.xlu0 %v2530_v50, %s1787_s30 }
 0x22c   : > { %v1080_v36 = vpop.permute.xlu2 %1079 }
 0x231   : > { %1017 = vrot.lane.b32.xlu1 %v2538_v17, %s1788_s6 }
 0x232   : > { %1019 = vrot.lane.b32.xlu2 %v2552_v15, %s1788_s6  ;;  %1015 = vrot.lane.b32.xlu0 %v2530_v50, %s1788_s6 }
 0x233   : > { %v2634_v10 = vpop.permute.xlu1 %1031 }
 0x234   : > { %v1064_v33 = vpop.permute.xlu2 %1063  ;;  %v1078_v48 = vpop.permute.xlu0 %1077 }
 0x235   : > { %v1071_v2 = vsel %vm718_vm11, %v1062_v24, %v1064_v33  ;;  %v2640_v52 = vsel %vm755_vm12, %v1078_v48, %v1080_v36 }
 0x236   : > { %v2656_v56 = vmul.f32 %v1071_v2, %v3030_v28 }
 0x239   : > { %997 = vrot.lane.b32.xlu1 %v2528_v11, %s1787_s30  ;;  %s1715_s30 = scalar_lea.hbm %s1714_s28, 32 }
 0x23a   : > { %1013 = vrot.lane.b32.xlu2 %v2528_v11, %s1788_s6  ;;  %1029 = vrot.lane.b32.xlu0 %v2528_v11, %s1789_s14  ;;  %p1716_p1 = scmp.ne.s32.totalorder %s1714_s28, %s1715_s30  ;;  %p1721_p7 = scmp.lt.s32.totalorder %s1719_s15, %s1715_s30 }
 0x23b   : > { %v1048_v42 = vpop.permute.xlu1 %1047 }
 0x23c   : > { %v1084_v12 = vpop.permute.xlu2 %1083  ;;  %v1055_v49 = vsel %vm681_vm10, %v1046_v41, %v1048_v42  ;;  %v1050_v16 = vpop.permute.xlu0 %1049  ;;  %p1717_p3 = pnand %p1716_p1, %p1912_p4  ;;  %p1722_p8 = por %p1721_p7, %p1720_p12 }
 0x23d   : > { %v2652_v43 = vsel %vm755_vm12, %v1084_v12, %v1078_v48  ;;  %v2660_v8 = vmul.f32 %v1055_v49, %v3032_v40  ;;  %v1054_v21 = vsel %vm681_vm10, %v1048_v42, %v1050_v16  ;;  %v3037_v40 = vperm.slane %v2266_v44, 2 }
 0x23e   : > { %v2680_v57 = vmul.f32 %v1054_v21, %v3033_v25  ;;  %p1718_p5 = pneg %p1717_p3 }
 0x240   : > { %p1723_p9 = pnand %p1722_p8, %p1718_p5 }
 0x243   : > { %v1082_v47 = vpop.permute.xlu1 %1081 }
 0x244   : > { %v2666_v54 = vpop.permute.xlu2 %1033  ;;  %v2670_v39 = vsel %vm755_vm12, %v1082_v47, %v1084_v12  ;;  %v2674_v26 = vsel %vm755_vm12, %v1080_v36, %v1082_v47  ;;  %v1066_v34 = vpop.permute.xlu0 %1065  ;;  %v1226_v36 = vand.u32 1.0|1.0, %v1224_v61  ;;  %v3038_v47 = vperm.slane %v2266_v44, 3 }
 0x245   : > { %v1070_v22 = vsel %vm718_vm11, %v1064_v33, %v1066_v34 }
 0x246   : > { %v2684_v23 = vmul.f32 %v1070_v22, %v3034_v53  ;;  %1228 = vmatpush.bf16.msrb.mxu0 %v1226_v36  ;;  %1267 = vmatpush.bf16.msrb.mxu3 %v1226_v36 }
 0x247   : > { %1241 = vmatpush.bf16.msrb.mxu1 %v1226_v36  ;;  %1254 = vmatpush.bf16.msrb.mxu2 %v1226_v36 }
 0x24b   : > { %v1052_v51 = vpop.permute.xlu1 %1051 }
 0x24c   : > { %v2688_v9 = vpop.permute.xlu2 %1111  ;;  %v1053_v38 = vsel %vm681_vm10, %v1050_v16, %v1052_v51  ;;  %v1056_v46 = vsel %vm681_vm10, %v1052_v51, %v1046_v41  ;;  %v2694_v7 = vpop.permute.xlu0 %1035  ;;  %v3035_v41 = vperm.slane %v3031_v3, 2  ;;  %v3036_v16 = vperm.slane %v3031_v3, 3 }
 0x24e   : > { %v2704_v49 = vmul.f32 %v1053_v38, %v3035_v41  ;;  %v2708_v28 = vmul.f32 %v1056_v46, %v3036_v16  ;;  %v3039_v41 = vperm.slane %v2142_v29, 3 }
 0x253   : > { %v1068_v33 = vpop.permute.xlu1 %1067 }
 0x254   : > { %v2696_v2 = vpop.permute.xlu2 %1127  ;;  %v1069_v48 = vsel %vm718_vm11, %v1066_v34, %v1068_v33  ;;  %v1072_v42 = vsel %vm718_vm11, %v1068_v33, %v1062_v24  ;;  %v1158_v12 = vpop.permute.xlu0 %1157  ;;  %v3041_v24 = vperm.slane %v2192_v6, 0 }
 0x255   : > { %v2712_v21 = vmul.f32 %v1069_v48, %v3037_v40  ;;  %v2716_v22 = vmul.f32 %v1072_v42, %v3038_v47  ;;  %v3040_v40 = vperm.slane %v2192_v6, 3 }
 0x25b   : > { %v1176_v25 = vpop.permute.xlu1 %1175 }
 0x25c   : > { %v1144_v53 = vpop.permute.xlu2 %1143  ;;  %v1174_v51 = vpop.permute.xlu0 %1173 }
 0x25d   : > { %v1183_v44 = vsel %vm533_vm6, %v1174_v51, %v1176_v25 }
 0x25e   : > { %v1185_v34 = vmul.f32 %v1183_v44, %v3041_v24  ;;  %v3043_v44 = vperm.slane %v2142_v29, 2 }
 0x263   : > { %v2722_v38 = vpop.permute.xlu1 %1125 }
 0x264   : > { %v1164_v3 = vpop.permute.xlu2 %1163  ;;  %v1142_v46 = vpop.permute.xlu0 %1141 }
 0x265   : > { %v1168_v35 = vsel %vm496_vm5, %v1164_v3, %v1158_v12  ;;  %v1151_v33 = vsel %vm459_vm4, %v1142_v46, %v1144_v53 }
 0x266   : > { %v1172_v16 = vmul.f32 %v1168_v35, %v3039_v41  ;;  %v1153_v31 = vmul.f32 %v1151_v33, %v465_v59 }
 0x268   : > { %v1209_v24 = vpack.c.bf16 %v1153_v31, %v2560_v5  ;;  %v3046_v5 = vperm.slane %v2192_v6, 1 }
 0x26b   : > { %v1162_v36 = vpop.permute.xlu1 %1161 }
 0x26c   : > { %v1180_v61 = vpop.permute.xlu2 %1179  ;;  %v1160_v42 = vpop.permute.xlu0 %1159  ;;  %v1165_v35 = vsel %vm496_vm5, %v1162_v36, %v1164_v3  ;;  %v3044_v3 = vperm.slane %v2142_v29, 1 }
 0x26d   : > { %v1184_v48 = vsel %vm533_vm6, %v1180_v61, %v1174_v51  ;;  %v1167_v55 = vsel %vm496_vm5, %v1158_v12, %v1160_v42 }
 0x26e   : > { %v1188_v47 = vmul.f32 %v1184_v48, %v3040_v40  ;;  %v1169_v14 = vmul.f32 %v1167_v55, %v3042_v20  ;;  %v1166_v48 = vsel %vm496_vm5, %v1160_v42, %v1162_v36  ;;  %v1171_v55 = vmul.f32 %v1165_v35, %v3043_v44 }
 0x26f   : > { %v3045_v36 = vperm.slane %v2144_v30, 3  ;;  %v3047_v42 = vperm.slane %v2192_v6, 2  ;;  %v3048_v35 = vperm.slane %v2144_v30, 2 }
 0x270   : > { %v1216_v51 = vpack.c.bf16 %v1188_v47, %v1172_v16  ;;  %v1213_v58 = vpack.c.bf16 %v1185_v34, %v1169_v14 }
 0x272   : > { %1268 = vmatpush.bf16.msrb.mxu3 %v1216_v51  ;;  %1229 = vmatpush.bf16.msrb.mxu0 %v1213_v58  ;;  %v1170_v58 = vmul.f32 %v1166_v48, %v3044_v3 }
 0x273   : > { %v1178_v41 = vpop.permute.xlu1 %1177 }
 0x274   : > { %v1148_v12 = vpop.permute.xlu2 %1147  ;;  %v1181_v14 = vsel %vm533_vm6, %v1178_v41, %v1180_v61  ;;  %v1182_v20 = vsel %vm533_vm6, %v1176_v25, %v1178_v41  ;;  %v1096_v34 = vpop.permute.xlu0 %1095  ;;  %v1135_v41 = vsel %vm422_vm3, %v2722_v38, %v2696_v2 }
 0x275   : > { %v1152_v59 = vsel %vm459_vm4, %v1148_v12, %v1142_v46  ;;  %v1186_v31 = vmul.f32 %v1182_v20, %v3046_v5  ;;  %v1187_v16 = vmul.f32 %v1181_v14, %v3047_v42  ;;  %v1138_v30 = vmul.f32 %v1135_v41, %v429_v0  ;;  %v3049_v14 = vld [vmem:[#allocation23_spill] sm:$0xff] }
 0x276   : > { %v1156_v33 = vmul.f32 %v1152_v59, %v3045_v36  ;;  %1230 = vmatpush.bf16.msrb.mxu0 %v1209_v24  ;;  %v3050_v20 = vperm.slane %v3049_v14, 1  ;;  %v3052_v42 = vpack.c.bf16 %v2684_v23, %v2680_v57  ;;  %v3057_v41 = vperm.slane %v2071_v62, 2 }
 0x277   : > { %v1214_v46 = vpack.c.bf16 %v1186_v31, %v1170_v58  ;;  %v1215_v40 = vpack.c.bf16 %v1187_v16, %v1171_v55  ;;  %v3053_v16 = vperm.slane %v2073_v63, 0 }
 0x278   : > { %v1212_v61 = vpack.c.bf16 %v1156_v33, %v2596_v18 }
 0x279   : > { %1242 = vmatpush.bf16.msrb.mxu1 %v1214_v46  ;;  %1255 = vmatpush.bf16.msrb.mxu2 %v1215_v40 }
 0x27a   : > { %1269 = vmatpush.bf16.msrb.mxu3 %v1212_v61  ;;  %v3054_v61 = vperm.slane %v3049_v14, 0 }
 0x27b   : > { %v1146_v25 = vpop.permute.xlu1 %1145 }
 0x27c   : > { %v1149_v29 = vsel %vm459_vm4, %v1146_v25, %v1148_v12  ;;  %v1150_v47 = vsel %vm459_vm4, %v1144_v53, %v1146_v25  ;;  %v1110_v51 = vpop.permute.xlu0 %1109  ;;  %v1100_v3 = vpop.permute.xlu2 %1099  ;;  %v1089_v25 = vmul.f32 %v2640_v52, %v3054_v61  ;;  %v3055_v52 = vperm.slane %v2071_v62, 3 }
 0x27d   : > { %v1154_v6 = vmul.f32 %v1150_v47, %v466_v32  ;;  %v1155_v48 = vmul.f32 %v1149_v29, %v3048_v35  ;;  %v1119_v18 = vsel %vm385_vm1, %v1110_v51, %v2688_v9 }
 0x27e   : > { %v1122_v12 = vmul.f32 %v1119_v18, %v392_v1  ;;  %v1090_v1 = vmul.f32 %v2674_v26, %v3050_v20 }
 0x27f   : > { %v1210_v53 = vpack.c.bf16 %v1154_v6, %v2568_v37  ;;  %v1211_v24 = vpack.c.bf16 %v1155_v48, %v2582_v27 }
 0x280   : > { %v1206_v44 = vpack.c.bf16 %v1138_v30, %v1122_v12 }
 0x281   : > { %1243 = vmatpush.bf16.msrb.mxu1 %v1210_v53  ;;  %1256 = vmatpush.bf16.msrb.mxu2 %v1211_v24  ;;  %v3058_v53 = vperm.slane %v2107_v13, 2 }
 0x283   : > { %v1116_v32 = vpop.permute.xlu1 %1115 }
 0x284   : > { %v1094_v55 = vpop.permute.xlu0 %1093  ;;  %v1120_v0 = vsel %vm385_vm1, %v1116_v32, %v1110_v51  ;;  %v1004_v30 = vpop.permute.xlu2 %1003 }
 0x285   : > { %v1103_v59 = vsel %vm348_vm0, %v1094_v55, %v1096_v34  ;;  %1244 = vmatpush.bf16.msrb.mxu1 %v1206_v44  ;;  %v1104_v36 = vsel %vm348_vm0, %v1100_v3, %v1094_v55  ;;  %v1121_v26 = vmul.f32 %v1120_v0, %v391_v19 }
 0x286   : > { %v1106_v37 = vmul.f32 %v1103_v59, %v355_v45  ;;  %v3051_v45 = vperm.slane %v2107_v13, 0  ;;  %v1105_v46 = vmul.f32 %v1104_v36, %v3053_v16 }
 0x288   : > { %v1202_v27 = vpack.c.bf16 %v1106_v37, %v1090_v1  ;;  %v1201_v29 = vpack.c.bf16 %v1105_v46, %v1089_v25  ;;  %v3062_v1 = vperm.slane %v3049_v14, 3  ;;  %v3070_v25 = vld [vmem:[#allocation21_spill] sm:$0xff] }
 0x28a   : > { %1245 = vmatpush.bf16.msrb.mxu1 %v1202_v27  ;;  %v1092_v62 = vmul.f32 %v2652_v43, %v3062_v1  ;;  %v1038_v43 = vsel %vm644_vm8, %v2634_v10, %v2666_v54 }
 0x28b   : > { %v1132_v58 = vpop.permute.xlu1 %1131 }
 0x28c   : > { %v1136_v33 = vsel %vm422_vm3, %v1132_v58, %v2722_v38  ;;  %v1114_v5 = vpop.permute.xlu0 %1113 }
 0x28d   : > { %v1137_v31 = vmul.f32 %v1136_v33, %v3051_v45  ;;  %v1117_v38 = vsel %vm385_vm1, %v1114_v5, %v1116_v32  ;;  %v1118_v47 = vsel %vm385_vm1, %v2688_v9, %v1114_v5  ;;  %v3056_v9 = vperm.slane %v2107_v13, 3  ;;  %v1020_v33 = vpop.permute.xlu2 %1019 }
 0x28e   : > { %1246 = vmatpush.bf16.msrb.mxu1 %v3052_v42  ;;  %v1124_v6 = vmul.f32 %v1117_v38, %v3055_v52  ;;  %v1123_v12 = vmul.f32 %v1118_v47, %v3057_v41  ;;  %v3059_v32 = vperm.slane %v2073_v63, 3  ;;  %v3063_v13 = vperm.slane %v3049_v14, 2 }
 0x28f   : > { %v1205_v40 = vpack.c.bf16 %v1137_v31, %v1121_v26  ;;  %v3067_v26 = vpack.c.bf16 %v2716_v22, %v2708_v28  ;;  %v3071_v28 = vperm.slane %v3070_v25, 3 }
 0x290   : > { %v1091_v37 = vmul.f32 %v2670_v39, %v3063_v13 }
 0x291   : > { %1231 = vmatpush.bf16.msrb.mxu0 %v1205_v40  ;;  %v3069_v40 = vperm.slane %v2190_v4, 3 }
 0x293   : > { %v1098_v19 = vpop.permute.xlu1 %1097 }
 0x294   : > { %v1130_v57 = vpop.permute.xlu0 %1129  ;;  %v1101_v23 = vsel %vm348_vm0, %v1098_v19, %v1100_v3  ;;  %v1102_v35 = vsel %vm348_vm0, %v1096_v34, %v1098_v19  ;;  %v3060_v34 = vperm.slane %v2073_v63, 2  ;;  %v1037_v63 = vsel %vm644_vm8, %v2666_v54, %v2694_v7 }
 0x295   : > { %v1133_v51 = vsel %vm422_vm3, %v1130_v57, %v1132_v58  ;;  %1232 = vmatpush.bf16.msrb.mxu0 %v1201_v29  ;;  %v1134_v48 = vsel %vm422_vm3, %v2696_v2, %v1130_v57  ;;  %v1108_v44 = vmul.f32 %v1101_v23, %v3059_v32  ;;  %v3061_v2 = vpack.c.bf16 %v2656_v56, %v2660_v8  ;;  %v3064_v8 = vld [vmem:[#allocation20_spill] sm:$0xff]  ;;  %v324_v23 = vld [vmem:[#allocation10] sm:$0xf]  ;;  %v1014_v52 = vpop.permute.xlu2 %1013 }
 0x296   : > { %v1140_v18 = vmul.f32 %v1133_v51, %v3056_v9  ;;  %v1139_v24 = vmul.f32 %v1134_v48, %v3058_v53  ;;  %v1107_v59 = vmul.f32 %v1102_v35, %v3060_v34  ;;  %v3065_v14 = vperm.slane %v3064_v8, 3 }
 0x297   : > { %v1204_v3 = vpack.c.bf16 %v1108_v44, %v1092_v62  ;;  %v3066_v58 = vperm.slane %v3064_v8, 2  ;;  %v3068_v54 = vpack.c.bf16 %v2712_v21, %v2704_v49  ;;  %v3072_v49 = vperm.slane %v2190_v4, 2 }
 0x298   : > { %v1208_v55 = vpack.c.bf16 %v1140_v18, %v1124_v6  ;;  %v1207_v20 = vpack.c.bf16 %v1139_v24, %v1123_v12  ;;  %v1203_v56 = vpack.c.bf16 %v1107_v59, %v1091_v37  ;;  %v1044_v39 = vmul.f32 %v1037_v63, %v3065_v14 }
 0x299   : > { %1233 = vmatpush.bf16.msrb.mxu0 %v3061_v2  ;;  %v1043_v36 = vmul.f32 %v1038_v43, %v3066_v58  ;;  %v3073_v29 = vperm.slane %v3070_v25, 2  ;;  %vm1218_vm0 = vcmask 924672   ;;  %v3074_v18 = vperm.slane %v3064_v8, 0 }
 0x29a   : > { %1270 = vmatpush.bf16.msrb.mxu3 %v1208_v55  ;;  %1257 = vmatpush.bf16.msrb.mxu2 %v1207_v20  ;;  %v1196_v46 = vpack.c.bf16 %v2552_v15, %v1044_v39  ;;  %v3075_v12 = vperm.slane %v3064_v8, 1  ;;  %v1024_v24 = vsel %vm607_vm9, %v1020_v33, %v1014_v52  ;;  %v3077_v32 = vperm.slane %v2190_v4, 1 }
 0x29b   : > { %v1002_v27 = vpop.permute.xlu1 %1001  ;;  %v1195_v19 = vpack.c.bf16 %v2538_v17, %v1043_v36  ;;  %v3078_v59 = vperm.slane %v3070_v25, 0  ;;  %v3079_v20 = vperm.slane %v3070_v25, 1 }
 0x29c   : > { %v1000_v0 = vpop.permute.xlu0 %999  ;;  %v1005_v5 = vsel %vm570_vm7, %v1002_v27, %v1004_v30 }
 0x29d   : > { %v1006_v45 = vsel %vm570_vm7, %v1000_v0, %v1002_v27  ;;  %v1012_v61 = vmul.f32 %v1005_v5, %v3069_v40  ;;  %v1025_v2 = vmul.f32 %v1024_v24, %v3078_v59 }
 0x29e   : > { %1271 = vmatpush.bf16.msrb.mxu3 %v1204_v3  ;;  %1258 = vmatpush.bf16.msrb.mxu2 %v1203_v56  ;;  %v1011_v21 = vmul.f32 %v1006_v45, %v3072_v49 }
 0x2a2   : > { %1272 = vmatpush.bf16.msrb.mxu3 %v3067_v26  ;;  %1259 = vmatpush.bf16.msrb.mxu2 %v3068_v54 }
 0x2a3   : > { %v1018_v31 = vpop.permute.xlu1 %1017 }
 0x2a4   : > { %v1021_v42 = vsel %vm607_vm9, %v1018_v31, %v1020_v33  ;;  %v1016_v16 = vpop.permute.xlu0 %1015 }
 0x2a5   : > { %v1028_v22 = vmul.f32 %v1021_v42, %v3071_v28  ;;  %v1022_v38 = vsel %vm607_vm9, %v1016_v16, %v1018_v31 }
 0x2a6   : > { %v1027_v47 = vmul.f32 %v1022_v38, %v3073_v29  ;;  %1273 = vmatpush.bf16.msrb.mxu3 %v1196_v46  ;;  %1260 = vmatpush.bf16.msrb.mxu2 %v1195_v19 }
 0x2a7   : > { %v1192_v15 = vpack.c.bf16 %v1028_v22, %v1012_v61 }
 0x2a8   : > { %v1191_v57 = vpack.c.bf16 %v1027_v47, %v1011_v21 }
 0x2aa   : > { %1274 = vmatpush.bf16.msrb.mxu3 %v1192_v15  ;;  %1261 = vmatpush.bf16.msrb.mxu2 %v1191_v57 }
 0x2ab   : > { %v998_v51 = vpop.permute.xlu1 %997 }
 0x2ac   : > { %v1030_v6 = vpop.permute.xlu0 %1029  ;;  %v1007_v17 = vsel %vm570_vm7, %v998_v51, %v1000_v0  ;;  %v1008_v35 = vsel %vm570_vm7, %v1004_v30, %v998_v51  ;;  %v3076_v30 = vperm.slane %v2190_v4, 0 }
 0x2ad   : > { %v1039_v48 = vsel %vm644_vm8, %v1030_v6, %v2634_v10  ;;  %v1040_v9 = vsel %vm644_vm8, %v2694_v7, %v1030_v6  ;;  %1437 = vmatmul.msk.bf16.vlgmr.msrb.gmra.mxu3 %vm1218_vm0, %v324_v23  ;;  %1436 = vmatmul.msk.bf16.vlgmr.msrb.gmra.mxu2 %vm1218_vm0, %v324_v23  ;;  %v1023_v10 = vsel %vm607_vm9, %v1014_v52, %v1016_v16 }
 0x2ae   : > { %v1041_v41 = vmul.f32 %v1040_v9, %v3074_v18  ;;  %v1042_v53 = vmul.f32 %v1039_v48, %v3075_v12  ;;  %v1009_v7 = vmul.f32 %v1008_v35, %v3076_v30  ;;  %v1010_v44 = vmul.f32 %v1007_v17, %v3077_v32 }
 0x2af   : > { %v1026_v1 = vmul.f32 %v1023_v10, %v3079_v20 }
 0x2b0   : > { %v1193_v55 = vpack.c.bf16 %v2528_v11, %v1041_v41  ;;  %v1194_v34 = vpack.c.bf16 %v2530_v50, %v1042_v53  ;;  %v1189_v60 = vpack.c.bf16 %v1025_v2, %v1009_v7 }
 0x2b1   : > { %v1190_v62 = vpack.c.bf16 %v1026_v1, %v1010_v44 }
 0x2b2   : > { %1234 = vmatpush.bf16.msrb.mxu0 %v1193_v55  ;;  %1247 = vmatpush.bf16.msrb.mxu1 %v1194_v34 }
 0x2b6   : > { %1235 = vmatpush.bf16.msrb.mxu0 %v1189_v60  ;;  %1248 = vmatpush.bf16.msrb.mxu1 %v1190_v62 }
 0x2b9   : > { %1434 = vmatmul.msk.bf16.vlgmr.msrb.gmra.mxu0 %vm1218_vm0, %v324_v23  ;;  %1435 = vmatmul.msk.bf16.vlgmr.msrb.gmra.mxu1 %vm1218_vm0, %v324_v23 }
 0x330   : > { %v1276_v4 = vpop.f32.mrf.mxu3  ;;  %v1263_v11 = vpop.f32.mrf.mxu2 }
 0x331   : > { %1283 = vst [vmem:[%s306_s23 + $0x18] sm:$0xff] %v1276_v4 }
 0x332   : > { %1282 = vst [vmem:[%s306_s23 + $0x10] sm:$0xff] %v1263_v11 }
 0x336   : > { %v1237_v50 = vpop.f32.mrf.mxu0  ;;  %v1250_v13 = vpop.f32.mrf.mxu1 }
 0x337   : > { %1280 = vst [vmem:[%s306_s23] sm:$0xff] %v1237_v50 }
 0x338   : > { %1281 = vst [vmem:[%s306_s23 + $0x8] sm:$0xff] %v1250_v13  ;;  %v1278_v37 = vpop.f32.mrf.mxu3  ;;  %v1265_v27 = vpop.f32.mrf.mxu2 }
 0x339   : > { %1726 = shalt.err (!%p1723_p9)
}
 0x33a   : > { %1464 = dma.vmem_to_hbm [thread:$0]  (%p1912_p4), %s1299_s24, 512, %s1301_s27, %s1285_s25  }
 0x33e   : > { %v1239_v0 = vpop.f32.mrf.mxu0  ;;  %v1252_v3 = vpop.f32.mrf.mxu1 }
 0x33f PF: > { %s1312_s10 = sand.u32 1, %s1761_s18   ;;  %p3080_p10 = scmp.ge.s32.totalorder %s1773_s21, 2 }
 0x340   : > { %s1313_s17 = scalar_lea.sflag [#allocation4], %s1312_s10 }
 0x341   : > { %p1484_p13 = pnand %p3080_p10, %p1916_p6 }
 0x343   : > { %p1485_p11 = pneg %p1484_p13 }
 0x345   : > { %1756 = dma.done.wait (%p1485_p11), %s1313_s17, 512  }
 0x346   : > { %1758 = vsyncadd (%p1485_p11), %s1313_s17, 4294966784  ;;  %p20_p4 = scmp.ge.s32.totalorder %s1886_s29, 4   ;;  %s3081_s18 = smov %s1765_s19 }
 0x347   : > { %s3082_s19 = smov %s1769_s20  ;;  %s3083_s20 = smov %s1897_s8 }
 0x348   : > { %s3084_s21 = smov %s1886_s29  ;;  %22 = sbr.rel (!%p20_p4) target bundleno = 7 (0x7), region = 116 }
 0x34d   :  { %1319 = vsyncpa [#allocation3], 1 }
 0x34e   :  { %1321 = vsyncpa [#allocation3 + $0x1], 1 }
 0x34f   :  { %1322 = vsyncpa [#allocation6], 1 }
 0x350   :  { %1323 = vsyncpa [#allocation9], 1 }
 0x351   :  { %1324 = vsyncpa [#allocation4], 1 }
 0x352   :  { %1326 = vsyncpa [#allocation4 + $0x1], 1 }

</bundles_post_ra>
